<compile_context>
chip_gen: v7x
topology: tpu7x:2x2x1
jax: 0.10.0
libtpu: 0.0.40
codegen_flags: <defaults>
</compile_context>

<pallas_src>
import functools

import jax
import jax.numpy as jnp
from jax.experimental import pallas as pl
from jax.experimental.pallas import tpu as pltpu  # noqa: F401  (TPU backend)

NEG_SLOPE = 0.01   # torch leaky_relu_ default negative_slope
_SUBLANE = 8       # pad batch rows to a sublane multiple


def _round_up(n, m):
    return ((n + m - 1) // m) * m


def _leaky(x):
    return jnp.where(x > 0, x, NEG_SLOPE * x)


# --------------------------------------------------------------------------
# Shared in-kernel stacked-GRU recurrence (operates on values, not refs)
# --------------------------------------------------------------------------
def _run_gru_stack(x_flat, len_col, layers, h_inits, T, B, H, need_last_y):
    """x_flat: (T*B, In) time-major rows (row = t*B + b).
    len_col: (B, 1) f32 lengths.  layers: list of (wih, whh, bi, bhn) values
    with wih (In_l, 3H), whh (H, 3H), bi (1, 3H) [b_ih with r/z of b_hh folded
    in], bhn (1, H).  h_inits: list of (B, H) initial hiddens.
    Returns (list of per-layer final h, last-layer outputs (T*B, H) or None)."""
    valid = [len_col > t for t in range(T)]            # hoisted (B,1) bool masks
    depth = len(layers)
    h_finals = []
    cur = x_flat
    y_last = None
    for layer in range(depth):
        wih, whh, bi, bhn = layers[layer]
        # Hoisted input projection: one big matmul instead of T tiny ones.
        gi_all = jnp.dot(cur, wih, preferred_element_type=jnp.float32) + bi
        h = h_inits[layer]
        store_y = need_last_y or (layer < depth - 1)
        ys = []
        # Fully unrolled time loop -> static slices, cross-step scheduling.
        for t in range(T):
            gi = gi_all[t * B:(t + 1) * B, :]                    # (B, 3H)
            gh = jnp.dot(h, whh, preferred_element_type=jnp.float32)
            r = jax.nn.sigmoid(gi[:, 0:H] + gh[:, 0:H])
            z = jax.nn.sigmoid(gi[:, H:2 * H] + gh[:, H:2 * H])
            n = jnp.tanh(gi[:, 2 * H:3 * H] + r * (gh[:, 2 * H:3 * H] + bhn))
            h_new = (1.0 - z) * n + z * h
            # packed-sequence semantics: freeze h / zero outputs past length
            h = jnp.where(valid[t], h_new, h)
            if store_y:
                ys.append(jnp.where(valid[t], h_new, 0.0))
        h_finals.append(h)
        if store_y:
            y = jnp.concatenate(ys, axis=0)                      # (T*B, H)
            if layer < depth - 1:
                cur = y
            else:
                y_last = y
    return h_finals, y_last


# --------------------------------------------------------------------------
# Pallas kernels
# --------------------------------------------------------------------------
def _encoder_kernel(*refs, T, B, H, depth, has_h0):
    """Fused stacked-GRU encoder: returns only the final hidden per layer."""
    idx = 0
    len_ref = refs[idx]; idx += 1
    x_ref = refs[idx]; idx += 1
    h0_ref = None
    if has_h0:
        h0_ref = refs[idx]; idx += 1
    layer_vals = []
    for _ in range(depth):
        wih_ref, whh_ref, bi_ref, bhn_ref = refs[idx:idx + 4]
        idx += 4
        layer_vals.append((wih_ref[...], whh_ref[...], bi_ref[...], bhn_ref[...]))
    h_out_ref = refs[idx]

    len_col = len_ref[...]                                       # (B, 1) f32
    x_flat = x_ref[...].reshape(T * B, x_ref.shape[2])
    if has_h0:
        h_inits = [h0_ref[layer] for layer in range(depth)]
    else:
        # h0 initialized in-kernel (no HBM zeros round-trip)
        h_inits = [jnp.zeros((B, H), jnp.float32) for _ in range(depth)]

    h_finals, _ = _run_gru_stack(x_flat, len_col, layer_vals, h_inits,
                                 T, B, H, need_last_y=False)
    for layer in range(depth):
        h_out_ref[layer] = h_finals[layer]


def _decoder_kernel(*refs, T, B, H, V, depth):
    """Fused decoder: to_middle Linear+leaky -> stacked GRU -> l1+leaky -> l2."""
    idx = 0
    len_ref = refs[idx]; idx += 1
    x_ref = refs[idx]; idx += 1
    henc_ref = refs[idx]; idx += 1
    midw_ref = refs[idx]; idx += 1
    midb_ref = refs[idx]; idx += 1
    layer_vals = []
    for _ in range(depth):
        wih_ref, whh_ref, bi_ref, bhn_ref = refs[idx:idx + 4]
        idx += 4
        layer_vals.append((wih_ref[...], whh_ref[...], bi_ref[...], bhn_ref[...]))
    l1w_ref, l1b_ref, l2w_ref, l2b_ref, out_ref = refs[idx:idx + 5]

    len_col = len_ref[...]                                       # (B, 1) f32
    # to_middle fused in-kernel; encoder_h arrives already batch-permuted
    # (permutation commutes with the row-wise Linear).
    henc = henc_ref[...].reshape(depth * B, H)
    hm = _leaky(jnp.dot(henc, midw_ref[...],
                        preferred_element_type=jnp.float32) + midb_ref[...])
    hm = hm.reshape(depth, B, H)
    h_inits = [hm[layer] for layer in range(depth)]

    x_flat = x_ref[...].reshape(T * B, x_ref.shape[2])
    _, y = _run_gru_stack(x_flat, len_col, layer_vals, h_inits,
                          T, B, H, need_last_y=True)

    # Fused output MLP epilogue (y never leaves VMEM): single lane slab store.
    s = _leaky(jnp.dot(y, l1w_ref[...],
                       preferred_element_type=jnp.float32) + l1b_ref[...])
    out_ref[...] = jnp.dot(s, l2w_ref[...],
                           preferred_element_type=jnp.float32) + l2b_ref[...]


# --------------------------------------------------------------------------
# pallas_call wrappers (batch padded to a sublane multiple here only)
# --------------------------------------------------------------------------
def _pad_batch_inputs(x, lengths, B, Bp):
    T, _, in_dim = x.shape
    xp = jnp.zeros((T, Bp, in_dim), jnp.float32).at[:, :B, :].set(x)
    len_col = jnp.zeros((Bp, 1), jnp.float32).at[:B, 0].set(
        lengths.astype(jnp.float32))
    return xp, len_col


def encoder_stack(x, lengths, layer_params, h0=None):
    T, B, _ = x.shape
    depth = len(layer_params)
    H = layer_params[0][1].shape[0]
    Bp = _round_up(B, _SUBLANE)
    xp, len_col = _pad_batch_inputs(x, lengths, B, Bp)
    args = [len_col, xp]
    if h0 is not None:
        h0p = jnp.zeros((depth, Bp, H), jnp.float32).at[:, :B, :].set(h0)
        args.append(h0p)
    for p in layer_params:
        args.extend(p)
    h = pl.pallas_call(
        functools.partial(_encoder_kernel, T=T, B=Bp, H=H, depth=depth,
                          has_h0=h0 is not None),
        out_shape=jax.ShapeDtypeStruct((depth, Bp, H), jnp.float32),
    )(*args)
    return h[:, :B, :]


def decoder_stack(x, lengths, h_enc_perm, params, vocab_size):
    T, B, _ = x.shape
    depth = len(params["dec_gru"])
    H = params["dec_gru"][0][1].shape[0]
    Bp = _round_up(B, _SUBLANE)
    xp, len_col = _pad_batch_inputs(x, lengths, B, Bp)
    hencp = jnp.zeros((depth, Bp, H), jnp.float32).at[:, :B, :].set(h_enc_perm)
    args = [len_col, xp, hencp, params["middle_w"], params["middle_b"]]
    for p in params["dec_gru"]:
        args.extend(p)
    args.extend([params["l1_w"], params["l1_b"], params["l2_w"], params["l2_b"]])
    out = pl.pallas_call(
        functools.partial(_decoder_kernel, T=T, B=Bp, H=H, V=vocab_size,
                          depth=depth),
        out_shape=jax.ShapeDtypeStruct((T * Bp, vocab_size), jnp.float32),
    )(*args)
    return out.reshape(T, Bp, vocab_size)[:, :B, :]               # (T, B, V)


# --------------------------------------------------------------------------
# Plain-JAX glue mirroring GenModel2 (padding, sorting, embedding lookup)
# --------------------------------------------------------------------------
def pad_list(tokens, trees, max_len):
    """Equivalent of GenModel2.pad_list (host-side glue)."""
    lengths = jnp.array([len(t) for t in tokens], jnp.int32)
    B = len(tokens)
    Tmax = int(lengths.max())
    tok = jnp.zeros((B, Tmax), jnp.int32)
    tre = jnp.zeros((B, Tmax, 4), jnp.float32)
    for i in range(B):
        l = len(tokens[i])
        tok = tok.at[i, :l].set(jnp.asarray(tokens[i], jnp.int32))
        tre = tre.at[i, :l, :].set(jnp.asarray(trees[i], jnp.float32))
    if Tmax > max_len:
        tok = tok[:, :max_len]
        tre = tre[:, :max_len]
        lengths = jnp.minimum(lengths, max_len)
    perm_idx = jnp.argsort(-lengths)            # descending sort by length
    lengths_sorted = lengths[perm_idx]
    tok = tok[perm_idx].T                                  # (T, B)
    tre = jnp.transpose(tre[perm_idx], (1, 0, 2))          # (T, B, 4)
    return tok, tre, perm_idx, lengths_sorted


def embed(params, tokens, trees, args):
    """Emb.forward; packing is replaced by (feats, lengths)."""
    tok, tre, perm_idx, lengths = pad_list(tokens, trees, args["max_len"])
    x = params["emb"][tok]                                 # (T, B, nFeats)
    x = jnp.concatenate([x, tre * 0.1], axis=2)            # (T, B, nFeats+4)
    return x, lengths, perm_idx


def encode(gru_params, feats, lengths, perm_idx, h_in=None):
    """GenModel2.encode (bidirectional=False, only final h needed)."""
    h0 = None if h_in is None else h_in[:, perm_idx, :]
    h = encoder_stack(feats, lengths, gru_params, h0=h0)
    unperm_idx = jnp.argsort(perm_idx)
    return h[:, unperm_idx, :]


def decoder_forward(params, feats, lengths, encoder_h, perm_idx, args):
    h_perm = encoder_h[:, perm_idx, :]     # permute first (commutes w/ to_middle)
    score = decoder_stack(feats, lengths, h_perm, params, args["vocab_size"])
    score = jnp.transpose(score, (1, 0, 2))                # (B, T, vocab)
    unperm_idx = jnp.argsort(perm_idx)
    return score[unperm_idx]


def gen_model2_forward(params, batch, args):
    (known_tokens, known_trees, to_prove_tokens, to_prove_trees,
     out_tokens, out_trees) = batch
    k_feats, k_len, k_perm = embed(params, known_tokens, known_trees, args)
    p_feats, p_len, p_perm = embed(params, to_prove_tokens, to_prove_trees, args)
    known_h = encode(params["gru1"], k_feats, k_len, k_perm)
    to_prove_h = encode(params["gru2"], p_feats, p_len, p_perm, h_in=known_h)
    o_feats, o_len, o_perm = embed(params, out_tokens, out_trees, args)
    return decoder_forward(params, o_feats, o_len, to_prove_h, o_perm, args)


# --------------------------------------------------------------------------
# Deterministic parameter init (shapes from the module's __init__)
# --------------------------------------------------------------------------
def init_gru_params(key, input_size, hidden, depth):
    bound = 1.0 / float(hidden) ** 0.5
    layers = []
    for layer in range(depth):
        in_dim = input_size if layer == 0 else hidden
        key, k1, k2, k3, k4 = jax.random.split(key, 5)
        w_ih = jax.random.uniform(k1, (in_dim, 3 * hidden), jnp.float32, -bound, bound)
        w_hh = jax.random.uniform(k2, (hidden, 3 * hidden), jnp.float32, -bound, bound)
        b_ih = jax.random.uniform(k3, (1, 3 * hidden), jnp.float32, -bound, bound)
        b_hh = jax.random.uniform(k4, (1, 3 * hidden), jnp.float32, -bound, bound)
        # Merge the r/z parts of b_hh into b_ih (they always add together);
        # the n-part of b_hh stays separate (it sits inside r * (...)).
        b_i = b_ih.at[:, :2 * hidden].add(b_hh[:, :2 * hidden])
        b_hn = b_hh[:, 2 * hidden:]
        layers.append((w_ih, w_hh, b_i, b_hn))
    return layers, key


def init_params(key, args):
    F, V, D = args["nFeats"], args["vocab_size"], args["gru_depth"]
    in_dim = F + 4                                        # use_tree=True
    key, ke, km, k1, k2 = jax.random.split(key, 5)
    params = {}
    params["emb"] = jax.random.normal(ke, (V, F), jnp.float32) * (2.0 / F) ** 0.5
    params["gru1"], key = init_gru_params(key, in_dim, F, D)
    params["gru2"], key = init_gru_params(key, in_dim, F, D)
    params["dec_gru"], key = init_gru_params(key, in_dim, F, D)
    params["middle_w"] = jax.random.normal(km, (F, F), jnp.float32) * (2.0 / F) ** 0.5
    params["middle_b"] = jnp.zeros((1, F), jnp.float32)
    params["l1_w"] = jax.random.normal(k1, (F, F), jnp.float32) * (1.0 / F) ** 0.5
    params["l1_b"] = jnp.zeros((1, F), jnp.float32)
    params["l2_w"] = jax.random.normal(k2, (F, V), jnp.float32) * (1.0 / F) ** 0.5
    params["l2_b"] = jnp.zeros((1, V), jnp.float32)
    return params


# --------------------------------------------------------------------------
# Main
# --------------------------------------------------------------------------
if __name__ == "__main__":
    args = dict(nFeats=32, gru_depth=2, vocab_size=64, max_len=16,
                bidirectional=False, no_use_tree=False)
    key = jax.random.PRNGKey(0)
    params = init_params(key, args)

    def make_seqs(key, lengths, vocab):
        toks, trees = [], []
        for L in lengths:
            key, kt, kr = jax.random.split(key, 3)
            toks.append(list(map(int, jax.random.randint(kt, (L,), 0, vocab))))
            trees.append(jax.random.normal(kr, (L, 4), jnp.float32))
        return toks, trees, key

    dkey = jax.random.PRNGKey(0)
    known_tokens, known_trees, dkey = make_seqs(dkey, [5, 7, 4], args["vocab_size"])
    to_prove_tokens, to_prove_trees, dkey = make_seqs(dkey, [6, 3, 8], args["vocab_size"])
    out_tokens, out_trees, dkey = make_seqs(dkey, [4, 6, 5], args["vocab_size"])

    batch = (known_tokens, known_trees, to_prove_tokens, to_prove_trees,
             out_tokens, out_trees)

    score = gen_model2_forward(params, batch, args)
    score = jax.block_until_ready(score)

    expected_shape = (3, 6, args["vocab_size"])   # (batch, max out len, vocab)
    assert score.shape == expected_shape, score.shape
    assert bool(jnp.all(jnp.isfinite(score)))
    # TODO(synk): dropout between GRU layers is a no-op at inference and is omitted.
    print("KERNEL_OK")
</pallas_src>

<mosaic_0001>
module attributes {stable_mosaic.version = 11 : i64} {
  func.func @_encoder_kernel(%arg0: memref<8x1xf32, #tpu.memory_space<vmem>>, %arg1: memref<7x8x36xf32, #tpu.memory_space<vmem>>, %arg2: memref<36x96xf32, #tpu.memory_space<vmem>>, %arg3: memref<32x96xf32, #tpu.memory_space<vmem>>, %arg4: memref<1x96xf32, #tpu.memory_space<vmem>>, %arg5: memref<1x32xf32, #tpu.memory_space<vmem>>, %arg6: memref<32x96xf32, #tpu.memory_space<vmem>>, %arg7: memref<32x96xf32, #tpu.memory_space<vmem>>, %arg8: memref<1x96xf32, #tpu.memory_space<vmem>>, %arg9: memref<1x32xf32, #tpu.memory_space<vmem>>, %arg10: memref<2x8x32xf32, #tpu.memory_space<vmem>>) attributes {dimension_semantics = [], scalar_prefetch = 0 : i64, scratch_operands = 0 : i64, tpu.core_type = #tpu.core_type<tc>} {
    %c0 = arith.constant 0 : index
    %c0_0 = arith.constant 0 : index
    %0 = vector.load %arg2[%c0, %c0_0] : memref<36x96xf32, #tpu.memory_space<vmem>>, vector<36x96xf32>
    %c0_1 = arith.constant 0 : index
    %c0_2 = arith.constant 0 : index
    %1 = vector.load %arg3[%c0_1, %c0_2] : memref<32x96xf32, #tpu.memory_space<vmem>>, vector<32x96xf32>
    %c0_3 = arith.constant 0 : index
    %c0_4 = arith.constant 0 : index
    %2 = vector.load %arg4[%c0_3, %c0_4] : memref<1x96xf32, #tpu.memory_space<vmem>>, vector<1x96xf32>
    %c0_5 = arith.constant 0 : index
    %c0_6 = arith.constant 0 : index
    %3 = vector.load %arg5[%c0_5, %c0_6] : memref<1x32xf32, #tpu.memory_space<vmem>>, vector<1x32xf32>
    %c0_7 = arith.constant 0 : index
    %c0_8 = arith.constant 0 : index
    %4 = vector.load %arg6[%c0_7, %c0_8] : memref<32x96xf32, #tpu.memory_space<vmem>>, vector<32x96xf32>
    %c0_9 = arith.constant 0 : index
    %c0_10 = arith.constant 0 : index
    %5 = vector.load %arg7[%c0_9, %c0_10] : memref<32x96xf32, #tpu.memory_space<vmem>>, vector<32x96xf32>
    %c0_11 = arith.constant 0 : index
    %c0_12 = arith.constant 0 : index
    %6 = vector.load %arg8[%c0_11, %c0_12] : memref<1x96xf32, #tpu.memory_space<vmem>>, vector<1x96xf32>
    %c0_13 = arith.constant 0 : index
    %c0_14 = arith.constant 0 : index
    %7 = vector.load %arg9[%c0_13, %c0_14] : memref<1x32xf32, #tpu.memory_space<vmem>>, vector<1x32xf32>
    %c0_15 = arith.constant 0 : index
    %c0_16 = arith.constant 0 : index
    %8 = vector.load %arg0[%c0_15, %c0_16] : memref<8x1xf32, #tpu.memory_space<vmem>>, vector<8x1xf32>
    %c0_17 = arith.constant 0 : index
    %c0_18 = arith.constant 0 : index
    %c0_19 = arith.constant 0 : index
    %9 = vector.load %arg1[%c0_17, %c0_18, %c0_19] : memref<7x8x36xf32, #tpu.memory_space<vmem>>, vector<7x8x36xf32>
    %10 = vector.shape_cast %9 : vector<7x8x36xf32> to vector<56x36xf32>
    %cst = arith.constant 0.000000e+00 : f32
    %11 = vector.broadcast %cst : f32 to vector<8x32xf32>
    %cst_20 = arith.constant 0.000000e+00 : f32
    %12 = vector.broadcast %cst_20 : f32 to vector<8x32xf32>
    %cst_21 = arith.constant 0.000000e+00 : f32
    %13 = vector.broadcast %cst_21 : f32 to vector<8x1xf32>
    %14 = arith.cmpf ogt, %8, %13 : vector<8x1xf32>
    %cst_22 = arith.constant 1.000000e+00 : f32
    %15 = vector.broadcast %cst_22 : f32 to vector<8x1xf32>
    %16 = arith.cmpf ogt, %8, %15 : vector<8x1xf32>
    %cst_23 = arith.constant 2.000000e+00 : f32
    %17 = vector.broadcast %cst_23 : f32 to vector<8x1xf32>
    %18 = arith.cmpf ogt, %8, %17 : vector<8x1xf32>
    %cst_24 = arith.constant 3.000000e+00 : f32
    %19 = vector.broadcast %cst_24 : f32 to vector<8x1xf32>
    %20 = arith.cmpf ogt, %8, %19 : vector<8x1xf32>
    %cst_25 = arith.constant 4.000000e+00 : f32
    %21 = vector.broadcast %cst_25 : f32 to vector<8x1xf32>
    %22 = arith.cmpf ogt, %8, %21 : vector<8x1xf32>
    %cst_26 = arith.constant 5.000000e+00 : f32
    %23 = vector.broadcast %cst_26 : f32 to vector<8x1xf32>
    %24 = arith.cmpf ogt, %8, %23 : vector<8x1xf32>
    %cst_27 = arith.constant 6.000000e+00 : f32
    %25 = vector.broadcast %cst_27 : f32 to vector<8x1xf32>
    %26 = arith.cmpf ogt, %8, %25 : vector<8x1xf32>
    %cst_28 = arith.constant dense<0.000000e+00> : vector<56x96xf32>
    %27 = tpu.matmul %10, %0, %cst_28 {dimension_numbers = #tpu.dot_dimension_numbers<[1], [0], [0], [1], [0, 0, 1, 1], [], []>} : vector<56x36xf32>, vector<36x96xf32>, vector<56x96xf32> -> vector<56x96xf32>
    %28 = vector.broadcast %2 : vector<1x96xf32> to vector<56x96xf32>
    %29 = arith.addf %27, %28 : vector<56x96xf32>
    %30 = vector.extract_strided_slice %29 {offsets = [0, 0], sizes = [8, 96], strides = [1, 1]} : vector<56x96xf32> to vector<8x96xf32>
    %cst_29 = arith.constant dense<0.000000e+00> : vector<8x96xf32>
    %31 = tpu.matmul %11, %1, %cst_29 {dimension_numbers = #tpu.dot_dimension_numbers<[1], [0], [0], [1], [0, 0, 1, 1], [], []>} : vector<8x32xf32>, vector<32x96xf32>, vector<8x96xf32> -> vector<8x96xf32>
    %32 = vector.extract_strided_slice %30 {offsets = [0, 0], sizes = [8, 32], strides = [1, 1]} : vector<8x96xf32> to vector<8x32xf32>
    %33 = vector.extract_strided_slice %31 {offsets = [0, 0], sizes = [8, 32], strides = [1, 1]} : vector<8x96xf32> to vector<8x32xf32>
    %34 = arith.addf %32, %33 : vector<8x32xf32>
    %35 = arith.negf %34 : vector<8x32xf32>
    %36 = math.exp %35 : vector<8x32xf32>
    %cst_30 = arith.constant 1.000000e+00 : f32
    %37 = vector.broadcast %cst_30 : f32 to vector<8x32xf32>
    %38 = arith.addf %37, %36 : vector<8x32xf32>
    %39 = arith.divf %37, %38 : vector<8x32xf32>
    %40 = vector.extract_strided_slice %30 {offsets = [0, 32], sizes = [8, 32], strides = [1, 1]} : vector<8x96xf32> to vector<8x32xf32>
    %41 = vector.extract_strided_slice %31 {offsets = [0, 32], sizes = [8, 32], strides = [1, 1]} : vector<8x96xf32> to vector<8x32xf32>
    %42 = arith.addf %40, %41 : vector<8x32xf32>
    %43 = arith.negf %42 : vector<8x32xf32>
    %44 = math.exp %43 : vector<8x32xf32>
    %cst_31 = arith.constant 1.000000e+00 : f32
    %45 = vector.broadcast %cst_31 : f32 to vector<8x32xf32>
    %46 = arith.addf %45, %44 : vector<8x32xf32>
    %47 = arith.divf %45, %46 : vector<8x32xf32>
    %48 = vector.extract_strided_slice %30 {offsets = [0, 64], sizes = [8, 32], strides = [1, 1]} : vector<8x96xf32> to vector<8x32xf32>
    %49 = vector.extract_strided_slice %31 {offsets = [0, 64], sizes = [8, 32], strides = [1, 1]} : vector<8x96xf32> to vector<8x32xf32>
    %50 = vector.broadcast %3 : vector<1x32xf32> to vector<8x32xf32>
    %51 = arith.addf %49, %50 : vector<8x32xf32>
    %52 = arith.mulf %39, %51 : vector<8x32xf32>
    %53 = arith.addf %48, %52 : vector<8x32xf32>
    %54 = math.tanh %53 : vector<8x32xf32>
    %cst_32 = arith.constant 1.000000e+00 : f32
    %55 = vector.broadcast %cst_32 : f32 to vector<8x32xf32>
    %56 = arith.subf %55, %47 : vector<8x32xf32>
    %57 = arith.mulf %56, %54 : vector<8x32xf32>
    %58 = arith.mulf %47, %11 : vector<8x32xf32>
    %59 = arith.addf %57, %58 : vector<8x32xf32>
    %60 = vector.shape_cast %14 : vector<8x1xi1> to vector<8x1xi1>
    %61 = vector.broadcast %60 : vector<8x1xi1> to vector<8x32xi1>
    %62 = arith.select %61, %59, %11 : vector<8x32xi1>, vector<8x32xf32>
    %cst_33 = arith.constant 0.000000e+00 : f32
    %63 = vector.shape_cast %14 : vector<8x1xi1> to vector<8x1xi1>
    %64 = vector.broadcast %63 : vector<8x1xi1> to vector<8x32xi1>
    %65 = vector.broadcast %cst_33 : f32 to vector<8x32xf32>
    %66 = arith.select %64, %59, %65 : vector<8x32xi1>, vector<8x32xf32>
    %67 = vector.extract_strided_slice %29 {offsets = [8, 0], sizes = [8, 96], strides = [1, 1]} : vector<56x96xf32> to vector<8x96xf32>
    %cst_34 = arith.constant dense<0.000000e+00> : vector<8x96xf32>
    %68 = tpu.matmul %62, %1, %cst_34 {dimension_numbers = #tpu.dot_dimension_numbers<[1], [0], [0], [1], [0, 0, 1, 1], [], []>} : vector<8x32xf32>, vector<32x96xf32>, vector<8x96xf32> -> vector<8x96xf32>
    %69 = vector.extract_strided_slice %67 {offsets = [0, 0], sizes = [8, 32], strides = [1, 1]} : vector<8x96xf32> to vector<8x32xf32>
    %70 = vector.extract_strided_slice %68 {offsets = [0, 0], sizes = [8, 32], strides = [1, 1]} : vector<8x96xf32> to vector<8x32xf32>
    %71 = arith.addf %69, %70 : vector<8x32xf32>
    %72 = arith.negf %71 : vector<8x32xf32>
    %73 = math.exp %72 : vector<8x32xf32>
    %cst_35 = arith.constant 1.000000e+00 : f32
    %74 = vector.broadcast %cst_35 : f32 to vector<8x32xf32>
    %75 = arith.addf %74, %73 : vector<8x32xf32>
    %76 = arith.divf %74, %75 : vector<8x32xf32>
    %77 = vector.extract_strided_slice %67 {offsets = [0, 32], sizes = [8, 32], strides = [1, 1]} : vector<8x96xf32> to vector<8x32xf32>
    %78 = vector.extract_strided_slice %68 {offsets = [0, 32], sizes = [8, 32], strides = [1, 1]} : vector<8x96xf32> to vector<8x32xf32>
    %79 = arith.addf %77, %78 : vector<8x32xf32>
    %80 = arith.negf %79 : vector<8x32xf32>
    %81 = math.exp %80 : vector<8x32xf32>
    %cst_36 = arith.constant 1.000000e+00 : f32
    %82 = vector.broadcast %cst_36 : f32 to vector<8x32xf32>
    %83 = arith.addf %82, %81 : vector<8x32xf32>
    %84 = arith.divf %82, %83 : vector<8x32xf32>
    %85 = vector.extract_strided_slice %67 {offsets = [0, 64], sizes = [8, 32], strides = [1, 1]} : vector<8x96xf32> to vector<8x32xf32>
    %86 = vector.extract_strided_slice %68 {offsets = [0, 64], sizes = [8, 32], strides = [1, 1]} : vector<8x96xf32> to vector<8x32xf32>
    %87 = vector.broadcast %3 : vector<1x32xf32> to vector<8x32xf32>
    %88 = arith.addf %86, %87 : vector<8x32xf32>
    %89 = arith.mulf %76, %88 : vector<8x32xf32>
    %90 = arith.addf %85, %89 : vector<8x32xf32>
    %91 = math.tanh %90 : vector<8x32xf32>
    %cst_37 = arith.constant 1.000000e+00 : f32
    %92 = vector.broadcast %cst_37 : f32 to vector<8x32xf32>
    %93 = arith.subf %92, %84 : vector<8x32xf32>
    %94 = arith.mulf %93, %91 : vector<8x32xf32>
    %95 = arith.mulf %84, %62 : vector<8x32xf32>
    %96 = arith.addf %94, %95 : vector<8x32xf32>
    %97 = vector.shape_cast %16 : vector<8x1xi1> to vector<8x1xi1>
    %98 = vector.broadcast %97 : vector<8x1xi1> to vector<8x32xi1>
    %99 = arith.select %98, %96, %62 : vector<8x32xi1>, vector<8x32xf32>
    %cst_38 = arith.constant 0.000000e+00 : f32
    %100 = vector.shape_cast %16 : vector<8x1xi1> to vector<8x1xi1>
    %101 = vector.broadcast %100 : vector<8x1xi1> to vector<8x32xi1>
    %102 = vector.broadcast %cst_38 : f32 to vector<8x32xf32>
    %103 = arith.select %101, %96, %102 : vector<8x32xi1>, vector<8x32xf32>
    %104 = vector.extract_strided_slice %29 {offsets = [16, 0], sizes = [8, 96], strides = [1, 1]} : vector<56x96xf32> to vector<8x96xf32>
    %cst_39 = arith.constant dense<0.000000e+00> : vector<8x96xf32>
    %105 = tpu.matmul %99, %1, %cst_39 {dimension_numbers = #tpu.dot_dimension_numbers<[1], [0], [0], [1], [0, 0, 1, 1], [], []>} : vector<8x32xf32>, vector<32x96xf32>, vector<8x96xf32> -> vector<8x96xf32>
    %106 = vector.extract_strided_slice %104 {offsets = [0, 0], sizes = [8, 32], strides = [1, 1]} : vector<8x96xf32> to vector<8x32xf32>
    %107 = vector.extract_strided_slice %105 {offsets = [0, 0], sizes = [8, 32], strides = [1, 1]} : vector<8x96xf32> to vector<8x32xf32>
    %108 = arith.addf %106, %107 : vector<8x32xf32>
    %109 = arith.negf %108 : vector<8x32xf32>
    %110 = math.exp %109 : vector<8x32xf32>
    %cst_40 = arith.constant 1.000000e+00 : f32
    %111 = vector.broadcast %cst_40 : f32 to vector<8x32xf32>
    %112 = arith.addf %111, %110 : vector<8x32xf32>
    %113 = arith.divf %111, %112 : vector<8x32xf32>
    %114 = vector.extract_strided_slice %104 {offsets = [0, 32], sizes = [8, 32], strides = [1, 1]} : vector<8x96xf32> to vector<8x32xf32>
    %115 = vector.extract_strided_slice %105 {offsets = [0, 32], sizes = [8, 32], strides = [1, 1]} : vector<8x96xf32> to vector<8x32xf32>
    %116 = arith.addf %114, %115 : vector<8x32xf32>
    %117 = arith.negf %116 : vector<8x32xf32>
    %118 = math.exp %117 : vector<8x32xf32>
    %cst_41 = arith.constant 1.000000e+00 : f32
    %119 = vector.broadcast %cst_41 : f32 to vector<8x32xf32>
    %120 = arith.addf %119, %118 : vector<8x32xf32>
    %121 = arith.divf %119, %120 : vector<8x32xf32>
    %122 = vector.extract_strided_slice %104 {offsets = [0, 64], sizes = [8, 32], strides = [1, 1]} : vector<8x96xf32> to vector<8x32xf32>
    %123 = vector.extract_strided_slice %105 {offsets = [0, 64], sizes = [8, 32], strides = [1, 1]} : vector<8x96xf32> to vector<8x32xf32>
    %124 = vector.broadcast %3 : vector<1x32xf32> to vector<8x32xf32>
    %125 = arith.addf %123, %124 : vector<8x32xf32>
    %126 = arith.mulf %113, %125 : vector<8x32xf32>
    %127 = arith.addf %122, %126 : vector<8x32xf32>
    %128 = math.tanh %127 : vector<8x32xf32>
    %cst_42 = arith.constant 1.000000e+00 : f32
    %129 = vector.broadcast %cst_42 : f32 to vector<8x32xf32>
    %130 = arith.subf %129, %121 : vector<8x32xf32>
    %131 = arith.mulf %130, %128 : vector<8x32xf32>
    %132 = arith.mulf %121, %99 : vector<8x32xf32>
    %133 = arith.addf %131, %132 : vector<8x32xf32>
    %134 = vector.shape_cast %18 : vector<8x1xi1> to vector<8x1xi1>
    %135 = vector.broadcast %134 : vector<8x1xi1> to vector<8x32xi1>
    %136 = arith.select %135, %133, %99 : vector<8x32xi1>, vector<8x32xf32>
    %cst_43 = arith.constant 0.000000e+00 : f32
    %137 = vector.shape_cast %18 : vector<8x1xi1> to vector<8x1xi1>
    %138 = vector.broadcast %137 : vector<8x1xi1> to vector<8x32xi1>
    %139 = vector.broadcast %cst_43 : f32 to vector<8x32xf32>
    %140 = arith.select %138, %133, %139 : vector<8x32xi1>, vector<8x32xf32>
    %141 = vector.extract_strided_slice %29 {offsets = [24, 0], sizes = [8, 96], strides = [1, 1]} : vector<56x96xf32> to vector<8x96xf32>
    %cst_44 = arith.constant dense<0.000000e+00> : vector<8x96xf32>
    %142 = tpu.matmul %136, %1, %cst_44 {dimension_numbers = #tpu.dot_dimension_numbers<[1], [0], [0], [1], [0, 0, 1, 1], [], []>} : vector<8x32xf32>, vector<32x96xf32>, vector<8x96xf32> -> vector<8x96xf32>
    %143 = vector.extract_strided_slice %141 {offsets = [0, 0], sizes = [8, 32], strides = [1, 1]} : vector<8x96xf32> to vector<8x32xf32>
    %144 = vector.extract_strided_slice %142 {offsets = [0, 0], sizes = [8, 32], strides = [1, 1]} : vector<8x96xf32> to vector<8x32xf32>
    %145 = arith.addf %143, %144 : vector<8x32xf32>
    %146 = arith.negf %145 : vector<8x32xf32>
    %147 = math.exp %146 : vector<8x32xf32>
    %cst_45 = arith.constant 1.000000e+00 : f32
    %148 = vector.broadcast %cst_45 : f32 to vector<8x32xf32>
    %149 = arith.addf %148, %147 : vector<8x32xf32>
    %150 = arith.divf %148, %149 : vector<8x32xf32>
    %151 = vector.extract_strided_slice %141 {offsets = [0, 32], sizes = [8, 32], strides = [1, 1]} : vector<8x96xf32> to vector<8x32xf32>
    %152 = vector.extract_strided_slice %142 {offsets = [0, 32], sizes = [8, 32], strides = [1, 1]} : vector<8x96xf32> to vector<8x32xf32>
    %153 = arith.addf %151, %152 : vector<8x32xf32>
    %154 = arith.negf %153 : vector<8x32xf32>
    %155 = math.exp %154 : vector<8x32xf32>
    %cst_46 = arith.constant 1.000000e+00 : f32
    %156 = vector.broadcast %cst_46 : f32 to vector<8x32xf32>
    %157 = arith.addf %156, %155 : vector<8x32xf32>
    %158 = arith.divf %156, %157 : vector<8x32xf32>
    %159 = vector.extract_strided_slice %141 {offsets = [0, 64], sizes = [8, 32], strides = [1, 1]} : vector<8x96xf32> to vector<8x32xf32>
    %160 = vector.extract_strided_slice %142 {offsets = [0, 64], sizes = [8, 32], strides = [1, 1]} : vector<8x96xf32> to vector<8x32xf32>
    %161 = vector.broadcast %3 : vector<1x32xf32> to vector<8x32xf32>
    %162 = arith.addf %160, %161 : vector<8x32xf32>
    %163 = arith.mulf %150, %162 : vector<8x32xf32>
    %164 = arith.addf %159, %163 : vector<8x32xf32>
    %165 = math.tanh %164 : vector<8x32xf32>
    %cst_47 = arith.constant 1.000000e+00 : f32
    %166 = vector.broadcast %cst_47 : f32 to vector<8x32xf32>
    %167 = arith.subf %166, %158 : vector<8x32xf32>
    %168 = arith.mulf %167, %165 : vector<8x32xf32>
    %169 = arith.mulf %158, %136 : vector<8x32xf32>
    %170 = arith.addf %168, %169 : vector<8x32xf32>
    %171 = vector.shape_cast %20 : vector<8x1xi1> to vector<8x1xi1>
    %172 = vector.broadcast %171 : vector<8x1xi1> to vector<8x32xi1>
    %173 = arith.select %172, %170, %136 : vector<8x32xi1>, vector<8x32xf32>
    %cst_48 = arith.constant 0.000000e+00 : f32
    %174 = vector.shape_cast %20 : vector<8x1xi1> to vector<8x1xi1>
    %175 = vector.broadcast %174 : vector<8x1xi1> to vector<8x32xi1>
    %176 = vector.broadcast %cst_48 : f32 to vector<8x32xf32>
    %177 = arith.select %175, %170, %176 : vector<8x32xi1>, vector<8x32xf32>
    %178 = vector.extract_strided_slice %29 {offsets = [32, 0], sizes = [8, 96], strides = [1, 1]} : vector<56x96xf32> to vector<8x96xf32>
    %cst_49 = arith.constant dense<0.000000e+00> : vector<8x96xf32>
    %179 = tpu.matmul %173, %1, %cst_49 {dimension_numbers = #tpu.dot_dimension_numbers<[1], [0], [0], [1], [0, 0, 1, 1], [], []>} : vector<8x32xf32>, vector<32x96xf32>, vector<8x96xf32> -> vector<8x96xf32>
    %180 = vector.extract_strided_slice %178 {offsets = [0, 0], sizes = [8, 32], strides = [1, 1]} : vector<8x96xf32> to vector<8x32xf32>
    %181 = vector.extract_strided_slice %179 {offsets = [0, 0], sizes = [8, 32], strides = [1, 1]} : vector<8x96xf32> to vector<8x32xf32>
    %182 = arith.addf %180, %181 : vector<8x32xf32>
    %183 = arith.negf %182 : vector<8x32xf32>
    %184 = math.exp %183 : vector<8x32xf32>
    %cst_50 = arith.constant 1.000000e+00 : f32
    %185 = vector.broadcast %cst_50 : f32 to vector<8x32xf32>
    %186 = arith.addf %185, %184 : vector<8x32xf32>
    %187 = arith.divf %185, %186 : vector<8x32xf32>
    %188 = vector.extract_strided_slice %178 {offsets = [0, 32], sizes = [8, 32], strides = [1, 1]} : vector<8x96xf32> to vector<8x32xf32>
    %189 = vector.extract_strided_slice %179 {offsets = [0, 32], sizes = [8, 32], strides = [1, 1]} : vector<8x96xf32> to vector<8x32xf32>
    %190 = arith.addf %188, %189 : vector<8x32xf32>
    %191 = arith.negf %190 : vector<8x32xf32>
    %192 = math.exp %191 : vector<8x32xf32>
    %cst_51 = arith.constant 1.000000e+00 : f32
    %193 = vector.broadcast %cst_51 : f32 to vector<8x32xf32>
    %194 = arith.addf %193, %192 : vector<8x32xf32>
    %195 = arith.divf %193, %194 : vector<8x32xf32>
    %196 = vector.extract_strided_slice %178 {offsets = [0, 64], sizes = [8, 32], strides = [1, 1]} : vector<8x96xf32> to vector<8x32xf32>
    %197 = vector.extract_strided_slice %179 {offsets = [0, 64], sizes = [8, 32], strides = [1, 1]} : vector<8x96xf32> to vector<8x32xf32>
    %198 = vector.broadcast %3 : vector<1x32xf32> to vector<8x32xf32>
    %199 = arith.addf %197, %198 : vector<8x32xf32>
    %200 = arith.mulf %187, %199 : vector<8x32xf32>
    %201 = arith.addf %196, %200 : vector<8x32xf32>
    %202 = math.tanh %201 : vector<8x32xf32>
    %cst_52 = arith.constant 1.000000e+00 : f32
    %203 = vector.broadcast %cst_52 : f32 to vector<8x32xf32>
    %204 = arith.subf %203, %195 : vector<8x32xf32>
    %205 = arith.mulf %204, %202 : vector<8x32xf32>
    %206 = arith.mulf %195, %173 : vector<8x32xf32>
    %207 = arith.addf %205, %206 : vector<8x32xf32>
    %208 = vector.shape_cast %22 : vector<8x1xi1> to vector<8x1xi1>
    %209 = vector.broadcast %208 : vector<8x1xi1> to vector<8x32xi1>
    %210 = arith.select %209, %207, %173 : vector<8x32xi1>, vector<8x32xf32>
    %cst_53 = arith.constant 0.000000e+00 : f32
    %211 = vector.shape_cast %22 : vector<8x1xi1> to vector<8x1xi1>
    %212 = vector.broadcast %211 : vector<8x1xi1> to vector<8x32xi1>
    %213 = vector.broadcast %cst_53 : f32 to vector<8x32xf32>
    %214 = arith.select %212, %207, %213 : vector<8x32xi1>, vector<8x32xf32>
    %215 = vector.extract_strided_slice %29 {offsets = [40, 0], sizes = [8, 96], strides = [1, 1]} : vector<56x96xf32> to vector<8x96xf32>
    %cst_54 = arith.constant dense<0.000000e+00> : vector<8x96xf32>
    %216 = tpu.matmul %210, %1, %cst_54 {dimension_numbers = #tpu.dot_dimension_numbers<[1], [0], [0], [1], [0, 0, 1, 1], [], []>} : vector<8x32xf32>, vector<32x96xf32>, vector<8x96xf32> -> vector<8x96xf32>
    %217 = vector.extract_strided_slice %215 {offsets = [0, 0], sizes = [8, 32], strides = [1, 1]} : vector<8x96xf32> to vector<8x32xf32>
    %218 = vector.extract_strided_slice %216 {offsets = [0, 0], sizes = [8, 32], strides = [1, 1]} : vector<8x96xf32> to vector<8x32xf32>
    %219 = arith.addf %217, %218 : vector<8x32xf32>
    %220 = arith.negf %219 : vector<8x32xf32>
    %221 = math.exp %220 : vector<8x32xf32>
    %cst_55 = arith.constant 1.000000e+00 : f32
    %222 = vector.broadcast %cst_55 : f32 to vector<8x32xf32>
    %223 = arith.addf %222, %221 : vector<8x32xf32>
    %224 = arith.divf %222, %223 : vector<8x32xf32>
    %225 = vector.extract_strided_slice %215 {offsets = [0, 32], sizes = [8, 32], strides = [1, 1]} : vector<8x96xf32> to vector<8x32xf32>
    %226 = vector.extract_strided_slice %216 {offsets = [0, 32], sizes = [8, 32], strides = [1, 1]} : vector<8x96xf32> to vector<8x32xf32>
    %227 = arith.addf %225, %226 : vector<8x32xf32>
    %228 = arith.negf %227 : vector<8x32xf32>
    %229 = math.exp %228 : vector<8x32xf32>
    %cst_56 = arith.constant 1.000000e+00 : f32
    %230 = vector.broadcast %cst_56 : f32 to vector<8x32xf32>
    %231 = arith.addf %230, %229 : vector<8x32xf32>
    %232 = arith.divf %230, %231 : vector<8x32xf32>
    %233 = vector.extract_strided_slice %215 {offsets = [0, 64], sizes = [8, 32], strides = [1, 1]} : vector<8x96xf32> to vector<8x32xf32>
    %234 = vector.extract_strided_slice %216 {offsets = [0, 64], sizes = [8, 32], strides = [1, 1]} : vector<8x96xf32> to vector<8x32xf32>
    %235 = vector.broadcast %3 : vector<1x32xf32> to vector<8x32xf32>
    %236 = arith.addf %234, %235 : vector<8x32xf32>
    %237 = arith.mulf %224, %236 : vector<8x32xf32>
    %238 = arith.addf %233, %237 : vector<8x32xf32>
    %239 = math.tanh %238 : vector<8x32xf32>
    %cst_57 = arith.constant 1.000000e+00 : f32
    %240 = vector.broadcast %cst_57 : f32 to vector<8x32xf32>
    %241 = arith.subf %240, %232 : vector<8x32xf32>
    %242 = arith.mulf %241, %239 : vector<8x32xf32>
    %243 = arith.mulf %232, %210 : vector<8x32xf32>
    %244 = arith.addf %242, %243 : vector<8x32xf32>
    %245 = vector.shape_cast %24 : vector<8x1xi1> to vector<8x1xi1>
    %246 = vector.broadcast %245 : vector<8x1xi1> to vector<8x32xi1>
    %247 = arith.select %246, %244, %210 : vector<8x32xi1>, vector<8x32xf32>
    %cst_58 = arith.constant 0.000000e+00 : f32
    %248 = vector.shape_cast %24 : vector<8x1xi1> to vector<8x1xi1>
    %249 = vector.broadcast %248 : vector<8x1xi1> to vector<8x32xi1>
    %250 = vector.broadcast %cst_58 : f32 to vector<8x32xf32>
    %251 = arith.select %249, %244, %250 : vector<8x32xi1>, vector<8x32xf32>
    %252 = vector.extract_strided_slice %29 {offsets = [48, 0], sizes = [8, 96], strides = [1, 1]} : vector<56x96xf32> to vector<8x96xf32>
    %cst_59 = arith.constant dense<0.000000e+00> : vector<8x96xf32>
    %253 = tpu.matmul %247, %1, %cst_59 {dimension_numbers = #tpu.dot_dimension_numbers<[1], [0], [0], [1], [0, 0, 1, 1], [], []>} : vector<8x32xf32>, vector<32x96xf32>, vector<8x96xf32> -> vector<8x96xf32>
    %254 = vector.extract_strided_slice %252 {offsets = [0, 0], sizes = [8, 32], strides = [1, 1]} : vector<8x96xf32> to vector<8x32xf32>
    %255 = vector.extract_strided_slice %253 {offsets = [0, 0], sizes = [8, 32], strides = [1, 1]} : vector<8x96xf32> to vector<8x32xf32>
    %256 = arith.addf %254, %255 : vector<8x32xf32>
    %257 = arith.negf %256 : vector<8x32xf32>
    %258 = math.exp %257 : vector<8x32xf32>
    %cst_60 = arith.constant 1.000000e+00 : f32
    %259 = vector.broadcast %cst_60 : f32 to vector<8x32xf32>
    %260 = arith.addf %259, %258 : vector<8x32xf32>
    %261 = arith.divf %259, %260 : vector<8x32xf32>
    %262 = vector.extract_strided_slice %252 {offsets = [0, 32], sizes = [8, 32], strides = [1, 1]} : vector<8x96xf32> to vector<8x32xf32>
    %263 = vector.extract_strided_slice %253 {offsets = [0, 32], sizes = [8, 32], strides = [1, 1]} : vector<8x96xf32> to vector<8x32xf32>
    %264 = arith.addf %262, %263 : vector<8x32xf32>
    %265 = arith.negf %264 : vector<8x32xf32>
    %266 = math.exp %265 : vector<8x32xf32>
    %cst_61 = arith.constant 1.000000e+00 : f32
    %267 = vector.broadcast %cst_61 : f32 to vector<8x32xf32>
    %268 = arith.addf %267, %266 : vector<8x32xf32>
    %269 = arith.divf %267, %268 : vector<8x32xf32>
    %270 = vector.extract_strided_slice %252 {offsets = [0, 64], sizes = [8, 32], strides = [1, 1]} : vector<8x96xf32> to vector<8x32xf32>
    %271 = vector.extract_strided_slice %253 {offsets = [0, 64], sizes = [8, 32], strides = [1, 1]} : vector<8x96xf32> to vector<8x32xf32>
    %272 = vector.broadcast %3 : vector<1x32xf32> to vector<8x32xf32>
    %273 = arith.addf %271, %272 : vector<8x32xf32>
    %274 = arith.mulf %261, %273 : vector<8x32xf32>
    %275 = arith.addf %270, %274 : vector<8x32xf32>
    %276 = math.tanh %275 : vector<8x32xf32>
    %cst_62 = arith.constant 1.000000e+00 : f32
    %277 = vector.broadcast %cst_62 : f32 to vector<8x32xf32>
    %278 = arith.subf %277, %269 : vector<8x32xf32>
    %279 = arith.mulf %278, %276 : vector<8x32xf32>
    %280 = arith.mulf %269, %247 : vector<8x32xf32>
    %281 = arith.addf %279, %280 : vector<8x32xf32>
    %282 = vector.shape_cast %26 : vector<8x1xi1> to vector<8x1xi1>
    %283 = vector.broadcast %282 : vector<8x1xi1> to vector<8x32xi1>
    %284 = arith.select %283, %281, %247 : vector<8x32xi1>, vector<8x32xf32>
    %cst_63 = arith.constant 0.000000e+00 : f32
    %285 = vector.shape_cast %26 : vector<8x1xi1> to vector<8x1xi1>
    %286 = vector.broadcast %285 : vector<8x1xi1> to vector<8x32xi1>
    %287 = vector.broadcast %cst_63 : f32 to vector<8x32xf32>
    %288 = arith.select %286, %281, %287 : vector<8x32xi1>, vector<8x32xf32>
    %289 = tpu.concatenate %66, %103, %140, %177, %214, %251, %288 in 0 : vector<8x32xf32>, vector<8x32xf32>, vector<8x32xf32>, vector<8x32xf32>, vector<8x32xf32>, vector<8x32xf32>, vector<8x32xf32> -> vector<56x32xf32>
    %cst_64 = arith.constant dense<0.000000e+00> : vector<56x96xf32>
    %290 = tpu.matmul %289, %4, %cst_64 {dimension_numbers = #tpu.dot_dimension_numbers<[1], [0], [0], [1], [0, 0, 1, 1], [], []>} : vector<56x32xf32>, vector<32x96xf32>, vector<56x96xf32> -> vector<56x96xf32>
    %291 = vector.broadcast %6 : vector<1x96xf32> to vector<56x96xf32>
    %292 = arith.addf %290, %291 : vector<56x96xf32>
    %293 = vector.extract_strided_slice %292 {offsets = [0, 0], sizes = [8, 96], strides = [1, 1]} : vector<56x96xf32> to vector<8x96xf32>
    %cst_65 = arith.constant dense<0.000000e+00> : vector<8x96xf32>
    %294 = tpu.matmul %12, %5, %cst_65 {dimension_numbers = #tpu.dot_dimension_numbers<[1], [0], [0], [1], [0, 0, 1, 1], [], []>} : vector<8x32xf32>, vector<32x96xf32>, vector<8x96xf32> -> vector<8x96xf32>
    %295 = vector.extract_strided_slice %293 {offsets = [0, 0], sizes = [8, 32], strides = [1, 1]} : vector<8x96xf32> to vector<8x32xf32>
    %296 = vector.extract_strided_slice %294 {offsets = [0, 0], sizes = [8, 32], strides = [1, 1]} : vector<8x96xf32> to vector<8x32xf32>
    %297 = arith.addf %295, %296 : vector<8x32xf32>
    %298 = arith.negf %297 : vector<8x32xf32>
    %299 = math.exp %298 : vector<8x32xf32>
    %cst_66 = arith.constant 1.000000e+00 : f32
    %300 = vector.broadcast %cst_66 : f32 to vector<8x32xf32>
    %301 = arith.addf %300, %299 : vector<8x32xf32>
    %302 = arith.divf %300, %301 : vector<8x32xf32>
    %303 = vector.extract_strided_slice %293 {offsets = [0, 32], sizes = [8, 32], strides = [1, 1]} : vector<8x96xf32> to vector<8x32xf32>
    %304 = vector.extract_strided_slice %294 {offsets = [0, 32], sizes = [8, 32], strides = [1, 1]} : vector<8x96xf32> to vector<8x32xf32>
    %305 = arith.addf %303, %304 : vector<8x32xf32>
    %306 = arith.negf %305 : vector<8x32xf32>
    %307 = math.exp %306 : vector<8x32xf32>
    %cst_67 = arith.constant 1.000000e+00 : f32
    %308 = vector.broadcast %cst_67 : f32 to vector<8x32xf32>
    %309 = arith.addf %308, %307 : vector<8x32xf32>
    %310 = arith.divf %308, %309 : vector<8x32xf32>
    %311 = vector.extract_strided_slice %293 {offsets = [0, 64], sizes = [8, 32], strides = [1, 1]} : vector<8x96xf32> to vector<8x32xf32>
    %312 = vector.extract_strided_slice %294 {offsets = [0, 64], sizes = [8, 32], strides = [1, 1]} : vector<8x96xf32> to vector<8x32xf32>
    %313 = vector.broadcast %7 : vector<1x32xf32> to vector<8x32xf32>
    %314 = arith.addf %312, %313 : vector<8x32xf32>
    %315 = arith.mulf %302, %314 : vector<8x32xf32>
    %316 = arith.addf %311, %315 : vector<8x32xf32>
    %317 = math.tanh %316 : vector<8x32xf32>
    %cst_68 = arith.constant 1.000000e+00 : f32
    %318 = vector.broadcast %cst_68 : f32 to vector<8x32xf32>
    %319 = arith.subf %318, %310 : vector<8x32xf32>
    %320 = arith.mulf %319, %317 : vector<8x32xf32>
    %321 = arith.mulf %310, %12 : vector<8x32xf32>
    %322 = arith.addf %320, %321 : vector<8x32xf32>
    %323 = vector.shape_cast %14 : vector<8x1xi1> to vector<8x1xi1>
    %324 = vector.broadcast %323 : vector<8x1xi1> to vector<8x32xi1>
    %325 = arith.select %324, %322, %12 : vector<8x32xi1>, vector<8x32xf32>
    %326 = vector.extract_strided_slice %292 {offsets = [8, 0], sizes = [8, 96], strides = [1, 1]} : vector<56x96xf32> to vector<8x96xf32>
    %cst_69 = arith.constant dense<0.000000e+00> : vector<8x96xf32>
    %327 = tpu.matmul %325, %5, %cst_69 {dimension_numbers = #tpu.dot_dimension_numbers<[1], [0], [0], [1], [0, 0, 1, 1], [], []>} : vector<8x32xf32>, vector<32x96xf32>, vector<8x96xf32> -> vector<8x96xf32>
    %328 = vector.extract_strided_slice %326 {offsets = [0, 0], sizes = [8, 32], strides = [1, 1]} : vector<8x96xf32> to vector<8x32xf32>
    %329 = vector.extract_strided_slice %327 {offsets = [0, 0], sizes = [8, 32], strides = [1, 1]} : vector<8x96xf32> to vector<8x32xf32>
    %330 = arith.addf %328, %329 : vector<8x32xf32>
    %331 = arith.negf %330 : vector<8x32xf32>
    %332 = math.exp %331 : vector<8x32xf32>
    %cst_70 = arith.constant 1.000000e+00 : f32
    %333 = vector.broadcast %cst_70 : f32 to vector<8x32xf32>
    %334 = arith.addf %333, %332 : vector<8x32xf32>
    %335 = arith.divf %333, %334 : vector<8x32xf32>
    %336 = vector.extract_strided_slice %326 {offsets = [0, 32], sizes = [8, 32], strides = [1, 1]} : vector<8x96xf32> to vector<8x32xf32>
    %337 = vector.extract_strided_slice %327 {offsets = [0, 32], sizes = [8, 32], strides = [1, 1]} : vector<8x96xf32> to vector<8x32xf32>
    %338 = arith.addf %336, %337 : vector<8x32xf32>
    %339 = arith.negf %338 : vector<8x32xf32>
    %340 = math.exp %339 : vector<8x32xf32>
    %cst_71 = arith.constant 1.000000e+00 : f32
    %341 = vector.broadcast %cst_71 : f32 to vector<8x32xf32>
    %342 = arith.addf %341, %340 : vector<8x32xf32>
    %343 = arith.divf %341, %342 : vector<8x32xf32>
    %344 = vector.extract_strided_slice %326 {offsets = [0, 64], sizes = [8, 32], strides = [1, 1]} : vector<8x96xf32> to vector<8x32xf32>
    %345 = vector.extract_strided_slice %327 {offsets = [0, 64], sizes = [8, 32], strides = [1, 1]} : vector<8x96xf32> to vector<8x32xf32>
    %346 = vector.broadcast %7 : vector<1x32xf32> to vector<8x32xf32>
    %347 = arith.addf %345, %346 : vector<8x32xf32>
    %348 = arith.mulf %335, %347 : vector<8x32xf32>
    %349 = arith.addf %344, %348 : vector<8x32xf32>
    %350 = math.tanh %349 : vector<8x32xf32>
    %cst_72 = arith.constant 1.000000e+00 : f32
    %351 = vector.broadcast %cst_72 : f32 to vector<8x32xf32>
    %352 = arith.subf %351, %343 : vector<8x32xf32>
    %353 = arith.mulf %352, %350 : vector<8x32xf32>
    %354 = arith.mulf %343, %325 : vector<8x32xf32>
    %355 = arith.addf %353, %354 : vector<8x32xf32>
    %356 = vector.shape_cast %16 : vector<8x1xi1> to vector<8x1xi1>
    %357 = vector.broadcast %356 : vector<8x1xi1> to vector<8x32xi1>
    %358 = arith.select %357, %355, %325 : vector<8x32xi1>, vector<8x32xf32>
    %359 = vector.extract_strided_slice %292 {offsets = [16, 0], sizes = [8, 96], strides = [1, 1]} : vector<56x96xf32> to vector<8x96xf32>
    %cst_73 = arith.constant dense<0.000000e+00> : vector<8x96xf32>
    %360 = tpu.matmul %358, %5, %cst_73 {dimension_numbers = #tpu.dot_dimension_numbers<[1], [0], [0], [1], [0, 0, 1, 1], [], []>} : vector<8x32xf32>, vector<32x96xf32>, vector<8x96xf32> -> vector<8x96xf32>
    %361 = vector.extract_strided_slice %359 {offsets = [0, 0], sizes = [8, 32], strides = [1, 1]} : vector<8x96xf32> to vector<8x32xf32>
    %362 = vector.extract_strided_slice %360 {offsets = [0, 0], sizes = [8, 32], strides = [1, 1]} : vector<8x96xf32> to vector<8x32xf32>
    %363 = arith.addf %361, %362 : vector<8x32xf32>
    %364 = arith.negf %363 : vector<8x32xf32>
    %365 = math.exp %364 : vector<8x32xf32>
    %cst_74 = arith.constant 1.000000e+00 : f32
    %366 = vector.broadcast %cst_74 : f32 to vector<8x32xf32>
    %367 = arith.addf %366, %365 : vector<8x32xf32>
    %368 = arith.divf %366, %367 : vector<8x32xf32>
    %369 = vector.extract_strided_slice %359 {offsets = [0, 32], sizes = [8, 32], strides = [1, 1]} : vector<8x96xf32> to vector<8x32xf32>
    %370 = vector.extract_strided_slice %360 {offsets = [0, 32], sizes = [8, 32], strides = [1, 1]} : vector<8x96xf32> to vector<8x32xf32>
    %371 = arith.addf %369, %370 : vector<8x32xf32>
    %372 = arith.negf %371 : vector<8x32xf32>
    %373 = math.exp %372 : vector<8x32xf32>
    %cst_75 = arith.constant 1.000000e+00 : f32
    %374 = vector.broadcast %cst_75 : f32 to vector<8x32xf32>
    %375 = arith.addf %374, %373 : vector<8x32xf32>
    %376 = arith.divf %374, %375 : vector<8x32xf32>
    %377 = vector.extract_strided_slice %359 {offsets = [0, 64], sizes = [8, 32], strides = [1, 1]} : vector<8x96xf32> to vector<8x32xf32>
    %378 = vector.extract_strided_slice %360 {offsets = [0, 64], sizes = [8, 32], strides = [1, 1]} : vector<8x96xf32> to vector<8x32xf32>
    %379 = vector.broadcast %7 : vector<1x32xf32> to vector<8x32xf32>
    %380 = arith.addf %378, %379 : vector<8x32xf32>
    %381 = arith.mulf %368, %380 : vector<8x32xf32>
    %382 = arith.addf %377, %381 : vector<8x32xf32>
    %383 = math.tanh %382 : vector<8x32xf32>
    %cst_76 = arith.constant 1.000000e+00 : f32
    %384 = vector.broadcast %cst_76 : f32 to vector<8x32xf32>
    %385 = arith.subf %384, %376 : vector<8x32xf32>
    %386 = arith.mulf %385, %383 : vector<8x32xf32>
    %387 = arith.mulf %376, %358 : vector<8x32xf32>
    %388 = arith.addf %386, %387 : vector<8x32xf32>
    %389 = vector.shape_cast %18 : vector<8x1xi1> to vector<8x1xi1>
    %390 = vector.broadcast %389 : vector<8x1xi1> to vector<8x32xi1>
    %391 = arith.select %390, %388, %358 : vector<8x32xi1>, vector<8x32xf32>
    %392 = vector.extract_strided_slice %292 {offsets = [24, 0], sizes = [8, 96], strides = [1, 1]} : vector<56x96xf32> to vector<8x96xf32>
    %cst_77 = arith.constant dense<0.000000e+00> : vector<8x96xf32>
    %393 = tpu.matmul %391, %5, %cst_77 {dimension_numbers = #tpu.dot_dimension_numbers<[1], [0], [0], [1], [0, 0, 1, 1], [], []>} : vector<8x32xf32>, vector<32x96xf32>, vector<8x96xf32> -> vector<8x96xf32>
    %394 = vector.extract_strided_slice %392 {offsets = [0, 0], sizes = [8, 32], strides = [1, 1]} : vector<8x96xf32> to vector<8x32xf32>
    %395 = vector.extract_strided_slice %393 {offsets = [0, 0], sizes = [8, 32], strides = [1, 1]} : vector<8x96xf32> to vector<8x32xf32>
    %396 = arith.addf %394, %395 : vector<8x32xf32>
    %397 = arith.negf %396 : vector<8x32xf32>
    %398 = math.exp %397 : vector<8x32xf32>
    %cst_78 = arith.constant 1.000000e+00 : f32
    %399 = vector.broadcast %cst_78 : f32 to vector<8x32xf32>
    %400 = arith.addf %399, %398 : vector<8x32xf32>
    %401 = arith.divf %399, %400 : vector<8x32xf32>
    %402 = vector.extract_strided_slice %392 {offsets = [0, 32], sizes = [8, 32], strides = [1, 1]} : vector<8x96xf32> to vector<8x32xf32>
    %403 = vector.extract_strided_slice %393 {offsets = [0, 32], sizes = [8, 32], strides = [1, 1]} : vector<8x96xf32> to vector<8x32xf32>
    %404 = arith.addf %402, %403 : vector<8x32xf32>
    %405 = arith.negf %404 : vector<8x32xf32>
    %406 = math.exp %405 : vector<8x32xf32>
    %cst_79 = arith.constant 1.000000e+00 : f32
    %407 = vector.broadcast %cst_79 : f32 to vector<8x32xf32>
    %408 = arith.addf %407, %406 : vector<8x32xf32>
    %409 = arith.divf %407, %408 : vector<8x32xf32>
    %410 = vector.extract_strided_slice %392 {offsets = [0, 64], sizes = [8, 32], strides = [1, 1]} : vector<8x96xf32> to vector<8x32xf32>
    %411 = vector.extract_strided_slice %393 {offsets = [0, 64], sizes = [8, 32], strides = [1, 1]} : vector<8x96xf32> to vector<8x32xf32>
    %412 = vector.broadcast %7 : vector<1x32xf32> to vector<8x32xf32>
    %413 = arith.addf %411, %412 : vector<8x32xf32>
    %414 = arith.mulf %401, %413 : vector<8x32xf32>
    %415 = arith.addf %410, %414 : vector<8x32xf32>
    %416 = math.tanh %415 : vector<8x32xf32>
    %cst_80 = arith.constant 1.000000e+00 : f32
    %417 = vector.broadcast %cst_80 : f32 to vector<8x32xf32>
    %418 = arith.subf %417, %409 : vector<8x32xf32>
    %419 = arith.mulf %418, %416 : vector<8x32xf32>
    %420 = arith.mulf %409, %391 : vector<8x32xf32>
    %421 = arith.addf %419, %420 : vector<8x32xf32>
    %422 = vector.shape_cast %20 : vector<8x1xi1> to vector<8x1xi1>
    %423 = vector.broadcast %422 : vector<8x1xi1> to vector<8x32xi1>
    %424 = arith.select %423, %421, %391 : vector<8x32xi1>, vector<8x32xf32>
    %425 = vector.extract_strided_slice %292 {offsets = [32, 0], sizes = [8, 96], strides = [1, 1]} : vector<56x96xf32> to vector<8x96xf32>
    %cst_81 = arith.constant dense<0.000000e+00> : vector<8x96xf32>
    %426 = tpu.matmul %424, %5, %cst_81 {dimension_numbers = #tpu.dot_dimension_numbers<[1], [0], [0], [1], [0, 0, 1, 1], [], []>} : vector<8x32xf32>, vector<32x96xf32>, vector<8x96xf32> -> vector<8x96xf32>
    %427 = vector.extract_strided_slice %425 {offsets = [0, 0], sizes = [8, 32], strides = [1, 1]} : vector<8x96xf32> to vector<8x32xf32>
    %428 = vector.extract_strided_slice %426 {offsets = [0, 0], sizes = [8, 32], strides = [1, 1]} : vector<8x96xf32> to vector<8x32xf32>
    %429 = arith.addf %427, %428 : vector<8x32xf32>
    %430 = arith.negf %429 : vector<8x32xf32>
    %431 = math.exp %430 : vector<8x32xf32>
    %cst_82 = arith.constant 1.000000e+00 : f32
    %432 = vector.broadcast %cst_82 : f32 to vector<8x32xf32>
    %433 = arith.addf %432, %431 : vector<8x32xf32>
    %434 = arith.divf %432, %433 : vector<8x32xf32>
    %435 = vector.extract_strided_slice %425 {offsets = [0, 32], sizes = [8, 32], strides = [1, 1]} : vector<8x96xf32> to vector<8x32xf32>
    %436 = vector.extract_strided_slice %426 {offsets = [0, 32], sizes = [8, 32], strides = [1, 1]} : vector<8x96xf32> to vector<8x32xf32>
    %437 = arith.addf %435, %436 : vector<8x32xf32>
    %438 = arith.negf %437 : vector<8x32xf32>
    %439 = math.exp %438 : vector<8x32xf32>
    %cst_83 = arith.constant 1.000000e+00 : f32
    %440 = vector.broadcast %cst_83 : f32 to vector<8x32xf32>
    %441 = arith.addf %440, %439 : vector<8x32xf32>
    %442 = arith.divf %440, %441 : vector<8x32xf32>
    %443 = vector.extract_strided_slice %425 {offsets = [0, 64], sizes = [8, 32], strides = [1, 1]} : vector<8x96xf32> to vector<8x32xf32>
    %444 = vector.extract_strided_slice %426 {offsets = [0, 64], sizes = [8, 32], strides = [1, 1]} : vector<8x96xf32> to vector<8x32xf32>
    %445 = vector.broadcast %7 : vector<1x32xf32> to vector<8x32xf32>
    %446 = arith.addf %444, %445 : vector<8x32xf32>
    %447 = arith.mulf %434, %446 : vector<8x32xf32>
    %448 = arith.addf %443, %447 : vector<8x32xf32>
    %449 = math.tanh %448 : vector<8x32xf32>
    %cst_84 = arith.constant 1.000000e+00 : f32
    %450 = vector.broadcast %cst_84 : f32 to vector<8x32xf32>
    %451 = arith.subf %450, %442 : vector<8x32xf32>
    %452 = arith.mulf %451, %449 : vector<8x32xf32>
    %453 = arith.mulf %442, %424 : vector<8x32xf32>
    %454 = arith.addf %452, %453 : vector<8x32xf32>
    %455 = vector.shape_cast %22 : vector<8x1xi1> to vector<8x1xi1>
    %456 = vector.broadcast %455 : vector<8x1xi1> to vector<8x32xi1>
    %457 = arith.select %456, %454, %424 : vector<8x32xi1>, vector<8x32xf32>
    %458 = vector.extract_strided_slice %292 {offsets = [40, 0], sizes = [8, 96], strides = [1, 1]} : vector<56x96xf32> to vector<8x96xf32>
    %cst_85 = arith.constant dense<0.000000e+00> : vector<8x96xf32>
    %459 = tpu.matmul %457, %5, %cst_85 {dimension_numbers = #tpu.dot_dimension_numbers<[1], [0], [0], [1], [0, 0, 1, 1], [], []>} : vector<8x32xf32>, vector<32x96xf32>, vector<8x96xf32> -> vector<8x96xf32>
    %460 = vector.extract_strided_slice %458 {offsets = [0, 0], sizes = [8, 32], strides = [1, 1]} : vector<8x96xf32> to vector<8x32xf32>
    %461 = vector.extract_strided_slice %459 {offsets = [0, 0], sizes = [8, 32], strides = [1, 1]} : vector<8x96xf32> to vector<8x32xf32>
    %462 = arith.addf %460, %461 : vector<8x32xf32>
    %463 = arith.negf %462 : vector<8x32xf32>
    %464 = math.exp %463 : vector<8x32xf32>
    %cst_86 = arith.constant 1.000000e+00 : f32
    %465 = vector.broadcast %cst_86 : f32 to vector<8x32xf32>
    %466 = arith.addf %465, %464 : vector<8x32xf32>
    %467 = arith.divf %465, %466 : vector<8x32xf32>
    %468 = vector.extract_strided_slice %458 {offsets = [0, 32], sizes = [8, 32], strides = [1, 1]} : vector<8x96xf32> to vector<8x32xf32>
    %469 = vector.extract_strided_slice %459 {offsets = [0, 32], sizes = [8, 32], strides = [1, 1]} : vector<8x96xf32> to vector<8x32xf32>
    %470 = arith.addf %468, %469 : vector<8x32xf32>
    %471 = arith.negf %470 : vector<8x32xf32>
    %472 = math.exp %471 : vector<8x32xf32>
    %cst_87 = arith.constant 1.000000e+00 : f32
    %473 = vector.broadcast %cst_87 : f32 to vector<8x32xf32>
    %474 = arith.addf %473, %472 : vector<8x32xf32>
    %475 = arith.divf %473, %474 : vector<8x32xf32>
    %476 = vector.extract_strided_slice %458 {offsets = [0, 64], sizes = [8, 32], strides = [1, 1]} : vector<8x96xf32> to vector<8x32xf32>
    %477 = vector.extract_strided_slice %459 {offsets = [0, 64], sizes = [8, 32], strides = [1, 1]} : vector<8x96xf32> to vector<8x32xf32>
    %478 = vector.broadcast %7 : vector<1x32xf32> to vector<8x32xf32>
    %479 = arith.addf %477, %478 : vector<8x32xf32>
    %480 = arith.mulf %467, %479 : vector<8x32xf32>
    %481 = arith.addf %476, %480 : vector<8x32xf32>
    %482 = math.tanh %481 : vector<8x32xf32>
    %cst_88 = arith.constant 1.000000e+00 : f32
    %483 = vector.broadcast %cst_88 : f32 to vector<8x32xf32>
    %484 = arith.subf %483, %475 : vector<8x32xf32>
    %485 = arith.mulf %484, %482 : vector<8x32xf32>
    %486 = arith.mulf %475, %457 : vector<8x32xf32>
    %487 = arith.addf %485, %486 : vector<8x32xf32>
    %488 = vector.shape_cast %24 : vector<8x1xi1> to vector<8x1xi1>
    %489 = vector.broadcast %488 : vector<8x1xi1> to vector<8x32xi1>
    %490 = arith.select %489, %487, %457 : vector<8x32xi1>, vector<8x32xf32>
    %491 = vector.extract_strided_slice %292 {offsets = [48, 0], sizes = [8, 96], strides = [1, 1]} : vector<56x96xf32> to vector<8x96xf32>
    %cst_89 = arith.constant dense<0.000000e+00> : vector<8x96xf32>
    %492 = tpu.matmul %490, %5, %cst_89 {dimension_numbers = #tpu.dot_dimension_numbers<[1], [0], [0], [1], [0, 0, 1, 1], [], []>} : vector<8x32xf32>, vector<32x96xf32>, vector<8x96xf32> -> vector<8x96xf32>
    %493 = vector.extract_strided_slice %491 {offsets = [0, 0], sizes = [8, 32], strides = [1, 1]} : vector<8x96xf32> to vector<8x32xf32>
    %494 = vector.extract_strided_slice %492 {offsets = [0, 0], sizes = [8, 32], strides = [1, 1]} : vector<8x96xf32> to vector<8x32xf32>
    %495 = arith.addf %493, %494 : vector<8x32xf32>
    %496 = arith.negf %495 : vector<8x32xf32>
    %497 = math.exp %496 : vector<8x32xf32>
    %cst_90 = arith.constant 1.000000e+00 : f32
    %498 = vector.broadcast %cst_90 : f32 to vector<8x32xf32>
    %499 = arith.addf %498, %497 : vector<8x32xf32>
    %500 = arith.divf %498, %499 : vector<8x32xf32>
    %501 = vector.extract_strided_slice %491 {offsets = [0, 32], sizes = [8, 32], strides = [1, 1]} : vector<8x96xf32> to vector<8x32xf32>
    %502 = vector.extract_strided_slice %492 {offsets = [0, 32], sizes = [8, 32], strides = [1, 1]} : vector<8x96xf32> to vector<8x32xf32>
    %503 = arith.addf %501, %502 : vector<8x32xf32>
    %504 = arith.negf %503 : vector<8x32xf32>
    %505 = math.exp %504 : vector<8x32xf32>
    %cst_91 = arith.constant 1.000000e+00 : f32
    %506 = vector.broadcast %cst_91 : f32 to vector<8x32xf32>
    %507 = arith.addf %506, %505 : vector<8x32xf32>
    %508 = arith.divf %506, %507 : vector<8x32xf32>
    %509 = vector.extract_strided_slice %491 {offsets = [0, 64], sizes = [8, 32], strides = [1, 1]} : vector<8x96xf32> to vector<8x32xf32>
    %510 = vector.extract_strided_slice %492 {offsets = [0, 64], sizes = [8, 32], strides = [1, 1]} : vector<8x96xf32> to vector<8x32xf32>
    %511 = vector.broadcast %7 : vector<1x32xf32> to vector<8x32xf32>
    %512 = arith.addf %510, %511 : vector<8x32xf32>
    %513 = arith.mulf %500, %512 : vector<8x32xf32>
    %514 = arith.addf %509, %513 : vector<8x32xf32>
    %515 = math.tanh %514 : vector<8x32xf32>
    %cst_92 = arith.constant 1.000000e+00 : f32
    %516 = vector.broadcast %cst_92 : f32 to vector<8x32xf32>
    %517 = arith.subf %516, %508 : vector<8x32xf32>
    %518 = arith.mulf %517, %515 : vector<8x32xf32>
    %519 = arith.mulf %508, %490 : vector<8x32xf32>
    %520 = arith.addf %518, %519 : vector<8x32xf32>
    %521 = vector.shape_cast %26 : vector<8x1xi1> to vector<8x1xi1>
    %522 = vector.broadcast %521 : vector<8x1xi1> to vector<8x32xi1>
    %523 = arith.select %522, %520, %490 : vector<8x32xi1>, vector<8x32xf32>
    %c0_93 = arith.constant 0 : index
    %c0_94 = arith.constant 0 : index
    %c0_95 = arith.constant 0 : index
    %524 = vector.load %arg10[%c0_93, %c0_94, %c0_95] : memref<2x8x32xf32, #tpu.memory_space<vmem>>, vector<1x8x32xf32>
    %525 = vector.shape_cast %524 : vector<1x8x32xf32> to vector<8x32xf32>
    %526 = vector.shape_cast %284 : vector<8x32xf32> to vector<1x8x32xf32>
    tpu.vector_store %arg10[%c0_93, %c0_94, %c0_95], %526 {strides = array<i32>} : memref<2x8x32xf32, #tpu.memory_space<vmem>>, vector<1x8x32xf32>,
    %c1 = arith.constant 1 : index
    %c0_96 = arith.constant 0 : index
    %c0_97 = arith.constant 0 : index
    %527 = vector.load %arg10[%c1, %c0_96, %c0_97] : memref<2x8x32xf32, #tpu.memory_space<vmem>>, vector<1x8x32xf32>
    %528 = vector.shape_cast %527 : vector<1x8x32xf32> to vector<8x32xf32>
    %529 = vector.shape_cast %523 : vector<8x32xf32> to vector<1x8x32xf32>
    tpu.vector_store %arg10[%c1, %c0_96, %c0_97], %529 {strides = array<i32>} : memref<2x8x32xf32, #tpu.memory_space<vmem>>, vector<1x8x32xf32>,
    return
  }
}

</mosaic_0001>

<bundles_post_ra>
// kernel: tpu_custom_call.1
= control target key start
LH: loop header
LB: loop body
LE: loop exit
PB: predicated region body
PF: predicated region fallthrough
CT: control target
= control target key end

     0   :  { %15 = vsyncpa [#allocation3], 0  ;;  %s3155_s0 = inlined_call_operand.vmem [shape: f32[8,1], index: 0, kind: input, shape index: {}]   ;;  %s3156_s1 = inlined_call_operand.hbm [shape: f32[7,8,36], index: 1, kind: input, shape index: {}]   ;;  %s3157_s2 = inlined_call_operand.hbm [shape: f32[36,96], index: 2, kind: input, shape index: {}]   ;;  %s3158_s3 = inlined_call_operand.hbm [shape: f32[32,96], index: 3, kind: input, shape index: {}]   ;;  %s3159_s4 = inlined_call_operand.vmem [shape: f32[1,96], index: 4, kind: input, shape index: {}]   ;;  %s3160_s5 = inlined_call_operand.vmem [shape: f32[1,32], index: 5, kind: input, shape index: {}]   ;;  %s3161_s6 = inlined_call_operand.hbm [shape: f32[32,96], index: 6, kind: input, shape index: {}]   ;;  %s3162_s7 = inlined_call_operand.vmem [shape: f32[32,96], index: 7, kind: input, shape index: {}]   ;;  %s3163_s8 = inlined_call_operand.vmem [shape: f32[1,96], index: 8, kind: input, shape index: {}]   ;;  %s3164_s9 = inlined_call_operand.vmem [shape: f32[1,32], index: 9, kind: input, shape index: {}]   ;;  %s3165_s10 = inlined_call_operand.hbm [shape: f32[2,8,32], index: 10, kind: output, shape index: {}]  }
   0x1   :  { %16 = vsyncpa [#allocation6], 0 }
   0x2   :  { %17 = vsyncpa [#allocation9], 0 }
   0x3   :  { %18 = vsyncpa [#allocation4], 0  ;;  %s2583_s13 = smov [#allocation5]   ;;  %s2584_s15 = smov [#allocation2]  }
   0x4   :  { %s38_s14 = sshll.u32 %s2583_s13, 4  ;;  %s26_s16 = sshll.u32 %s2584_s15, 4  ;;  %s39_s14 = int_to_ptr.vmem [resolvable:$true] %s38_s14  ;;  %s2651_s16 = int_to_ptr.vmem [resolvable:$true] %s26_s16 }
   0x5   :  { %s2465_s19 = scalar_lea.hbm %s3157_s2, 640 }
   0x6   :  { %p2466_p0 = scmp.ne.s32.totalorder %s3157_s2, %s2465_s19  ;;  %p2469_p1 = scmp.lt.u32.totalorder %s2465_s19, %s3157_s2 }
   0x8   :  { %p2471_p2 = pnand %p2469_p1, %p2466_p0 }
   0xa   :  { %2474 = shalt.err (!%p2471_p2)
}
   0xb   :  { %s2475_s24 = scalar_lea.vmem %s39_s14, 640  ;;  %p2480_p4 = scmp.lt.s32.totalorder %s39_s14, %s39_s14 }
   0xc   :  { %p2476_p3 = scmp.ne.s32.totalorder %s39_s14, %s2475_s24  ;;  %p2481_p5 = scmp.lt.s32.totalorder %s2475_s24, %s2475_s24 }
   0xe   :  { %p2482_p6 = por %p2481_p5, %p2480_p4 }
  0x10   :  { %p2483_p7 = pnand %p2482_p6, %p2476_p3 }
  0x12   :  { %2486 = shalt.err (!%p2483_p7)
}
  0x13   :  { %s2585_s25 = smov 128   ;;  %s2586_s26 = smov 8  }
  0x14   :  { %44 = dma.hbm_to_vmem [thread:$0]  %s3157_s2, 640, %s39_s14, [#allocation6], %s2585_s25, %s2585_s25, %s2586_s26  }
  0x15   :  { %s2487_s11 = scalar_lea.hbm %s3156_s1, 896 }
  0x16   :  { %p2488_p8 = scmp.ne.s32.totalorder %s3156_s1, %s2487_s11  ;;  %p2491_p9 = scmp.lt.u32.totalorder %s2487_s11, %s3156_s1 }
  0x18   :  { %p2493_p10 = pnand %p2491_p9, %p2488_p8 }
  0x1a   :  { %2496 = shalt.err (!%p2493_p10)
}
  0x1b   :  { %s2497_s18 = scalar_lea.vmem %s2651_s16, 896  ;;  %p2502_p12 = scmp.lt.s32.totalorder %s2651_s16, %s2651_s16 }
  0x1c   :  { %p2498_p11 = scmp.ne.s32.totalorder %s2651_s16, %s2497_s18  ;;  %p2503_p13 = scmp.lt.s32.totalorder %s2497_s18, %s2497_s18 }
  0x1e   :  { %p2504_p0 = por %p2503_p13, %p2502_p12 }
  0x20   :  { %p2505_p1 = pnand %p2504_p0, %p2498_p11 }
  0x22   :  { %2508 = shalt.err (!%p2505_p1)
}
  0x23   :  { %32 = dma.hbm_to_vmem [thread:$0]  %s3156_s1, 896, %s2651_s16, [#allocation3], %s2585_s25, %s2585_s25, %s2586_s26  }
  0x24   :  { %s2587_s19 = smov [#allocation7]   ;;  %s2588_s21 = smov [#allocation8]  }
  0x25   :  { %s50_s20 = sshll.u32 %s2587_s19, 4  ;;  %s66_s22 = sshll.u32 %s2588_s21, 4  ;;  %s51_s20 = int_to_ptr.vmem [resolvable:$true] %s50_s20  ;;  %s2688_s22 = int_to_ptr.vmem [resolvable:$true] %s66_s22 }
  0x26   :  { %s2509_s27 = scalar_lea.hbm %s3158_s3, 512 }
  0x27   :  { %p2510_p2 = scmp.ne.s32.totalorder %s3158_s3, %s2509_s27  ;;  %p2513_p3 = scmp.lt.u32.totalorder %s2509_s27, %s3158_s3 }
  0x29   :  { %p2515_p4 = pnand %p2513_p3, %p2510_p2 }
  0x2b   :  { %2518 = shalt.err (!%p2515_p4)
}
  0x2c   :  { %s2519_s1 = scalar_lea.vmem %s51_s20, 512  ;;  %p2524_p6 = scmp.lt.s32.totalorder %s51_s20, %s51_s20 }
  0x2d   :  { %p2520_p5 = scmp.ne.s32.totalorder %s51_s20, %s2519_s1  ;;  %p2525_p7 = scmp.lt.s32.totalorder %s2519_s1, %s2519_s1 }
  0x2f   :  { %p2526_p8 = por %p2525_p7, %p2524_p6 }
  0x31   :  { %p2527_p9 = pnand %p2526_p8, %p2520_p5 }
  0x33   :  { %2530 = shalt.err (!%p2527_p9)
}
  0x34   :  { %56 = dma.hbm_to_vmem [thread:$0]  %s3158_s3, 512, %s51_s20, [#allocation6], %s2585_s25, %s2585_s25, %s2586_s26  }
  0x35   :  { %s2531_s17 = scalar_lea.hbm %s3161_s6, 512 }
  0x36   :  { %p2532_p10 = scmp.ne.s32.totalorder %s3161_s6, %s2531_s17  ;;  %p2535_p11 = scmp.lt.u32.totalorder %s2531_s17, %s3161_s6 }
  0x38   :  { %p2537_p12 = pnand %p2535_p11, %p2532_p10 }
  0x3a   :  { %2540 = shalt.err (!%p2537_p12)
}
  0x3b   :  { %s2541_s21 = scalar_lea.vmem %s2688_s22, 512  ;;  %p2546_p0 = scmp.lt.s32.totalorder %s2688_s22, %s2688_s22 }
  0x3c   :  { %p2542_p13 = scmp.ne.s32.totalorder %s2688_s22, %s2541_s21  ;;  %p2547_p1 = scmp.lt.s32.totalorder %s2541_s21, %s2541_s21 }
  0x3e   :  { %p2548_p2 = por %p2547_p1, %p2546_p0 }
  0x40   :  { %p2549_p3 = pnand %p2548_p2, %p2542_p13 }
  0x42   :  { %2552 = shalt.err (!%p2549_p3)
}
  0x43   :  { %72 = dma.hbm_to_vmem [thread:$0]  %s3161_s6, 512, %s2688_s22, [#allocation9], %s2585_s25, %s2585_s25, %s2586_s26  }
  0x44   :  { %2575 = dma.done.wait [#allocation3], 896  }
  0x45   :  { %2576 = vsyncadd [#allocation3], 4294966400 }
  0x46   :  { %2577 = dma.done.wait [#allocation6], 1152  }
  0x47   :  { %2578 = vsyncadd [#allocation6], 4294966144 }
  0x48   :  { %2579 = dma.done.wait [#allocation9], 512  }
  0x49   :  { %2580 = vsyncadd [#allocation9], 4294966784  ;;  %v2589_v0 = vmov 0.0|0.0   ;;  %vm2590_vm0 = vmmov 0   ;;  %v2591_v1 = vmov 0.0   ;;  %v91_v2 = vld [vmem:[#allocation5] sm:$0xff] }
  0x4a   :  { %2270 = vmatprep.subr.bf16.mxu0 %v2589_v0  ;;  %2276 = vmatprep.subr.bf16.mxu1 %v2589_v0  ;;  %v92_v3 = vld [vmem:[#allocation5 + $0x8] sm:$0xff]  ;;  %v97_v6 = vld [vmem:[#allocation7 + $0x8] sm:$0xff]  ;;  %v94_v8 = vld [vmem:[#allocation5 + $0x18] sm:$0xff]  ;;  %s2592_s23 = smov 64   ;;  %vm155_vm1 = vcmask 1043456   ;;  %vm133_vm2 = vcmask 293888  }
  0x4b   :  { %2095 = vmatprep.mubr.msk.f32.mxu1 %vm2590_vm0, %v2591_v1  ;;  %2066 = vmatprep.mubr.msk.f32.mxu0 %vm2590_vm0, %v2591_v1  ;;  %v96_v4 = vld [vmem:[#allocation7] sm:$0xff]  ;;  %v2271_v5 = vpack.c.bf16 %v92_v3, %v91_v2  ;;  %v93_v7 = vld [vmem:[#allocation5 + $0x10] sm:$0xff]  ;;  %v98_v10 = vld [vmem:[#allocation7 + $0x10] sm:$0xff]  ;;  %v2593_v29 = vmov 0   ;;  %vm259_vm5 = vcmask 261120  }
  0x4c   :  { %v2731_v9 = vpack.c.bf16 %v97_v6, %v96_v4  ;;  %v99_v11 = vld [vmem:[#allocation7 + $0x18] sm:$0xff]  ;;  %v2274_v12 = vpack.c.bf16 %v94_v8, %v93_v7  ;;  %v113_v16 = vld [vmem:[#allocation2] sm:$0xff]  ;;  %2379 = vset.pattern.permute.xlu1 %v2593_v29  ;;  %2380 = vset.pattern.permute.xlu0 %v2593_v29  ;;  %v114_v37 = vld [vmem:[#allocation2 + $0x8] sm:$0xff] }
  0x4d   :  { %2272 = vmatpush3.bf16.msra.mxu0 %v2271_v5  ;;  %v1928_v13 = vld [vmem:[%s3160_s5] ss:$0 sm:$0xff]  ;;  %v2738_v14 = vpack.c.bf16 %v99_v11, %v98_v10  ;;  %v115_v63 = vld [vmem:[#allocation2 + $0x10] sm:$0xff] }
  0x4e   :  { %2278 = vmatpush3.bf16.msra.mxu1 %v2731_v9  ;;  %2273 = vmatprep.subr.bf16.mxu0 %v2589_v0  ;;  %v95_v15 = vld [vmem:[#allocation5 + $0x20] sm:$0xf] }
  0x4f   :  { %2279 = vmatprep.subr.bf16.mxu1 %v2589_v0  ;;  %345 = vrot.lane.b32.xlu0 %v1928_v13, %s2592_s23  ;;  %v2767_v23 = vld [vmem:[%s3159_s4] ss:$0 sm:$0xff] }
  0x50   :  { %v2775_v30 = vld [vmem:[%s3155_s0] sm:$0xff]  ;;  %s2594_s0 = smov 96  }
  0x51   :  { %2275 = vmatpush3.bf16.msra.mxu0 %v2274_v12  ;;  %vm120_vm3 = vcmp.gt.f32.partialorder %v2775_v30, 0.0  ;;  %vm121_vm6 = vcmp.gt.f32.partialorder %v2775_v30, 1.0  ;;  %vm122_vm8 = vcmp.gt.f32.partialorder %v2775_v30, 2.0  ;;  %vm123_vm10 = vcmp.gt.f32.partialorder %v2775_v30, 3.0 }
  0x52   :  { %2281 = vmatpush3.bf16.msra.mxu1 %v2738_v14  ;;  %2064 = vmatprep.subr.mxu0 %v2591_v1  ;;  %v368_v34 = vsel %vm120_vm3, 1, %v2593_v29  ;;  %v476_v57 = vsel %vm121_vm6, 1, %v2593_v29  ;;  %vm124_vm12 = vcmp.gt.f32.partialorder %v2775_v30, 4.0  ;;  %vm125_vm14 = vcmp.gt.f32.partialorder %v2775_v30, 5.0 }
  0x53   :  { %2282 = vmatprep.subr.bf16.mxu1 %v2589_v0 }
  0x55   :  { %2096 = vmatmul.mubr.f32.vlgmr.msra.gmra.mrb[0].mxu1 %v2591_v1  ;;  %2065 = vmatpush3.msk.msra.mxu0 %vm155_vm1, %v95_v15  ;;  %vm126_vm1 = vcmp.gt.f32.partialorder %v2775_v30, 6.0 }
  0x56   :  { %2067 = vmatmul.mubr.msk.f32.vlgmr.msra.gmra.mrb[0].mxu0 %vm133_vm2, %v113_v16  ;;  %2284 = vmatpush3.bf16.msra.mxu1 %v2731_v9 }
  0x57   :  { %2285 = vmatprep.subr.bf16.mxu1 %v2589_v0  ;;  %2069 = vmatprep.mubr.msk.f32.mxu0 %vm2590_vm0, %v2591_v1 }
  0x58   :  { %2106 = vmatprep.mubr.msk.f32.mxu1 %vm2590_vm0, %v2591_v1  ;;  %2300 = vmatprep.subr.bf16.mxu0 %v2589_v0 }
  0x59   :  { %2302 = vmatpush3.bf16.msra.mxu0 %v2731_v9 }
  0x5a   :  { %2287 = vmatpush3.bf16.msra.mxu1 %v2738_v14  ;;  %2303 = vmatprep.subr.bf16.mxu0 %v2589_v0 }
  0x5b   :  { %2288 = vmatprep.subr.bf16.mxu1 %v2589_v0  ;;  %2070 = vmatmul.mubr.msk.f32.gmra.mrb[2].mxu0 %vm133_vm2, %v114_v37 }
  0x5c   :  { %2072 = vmatprep.mubr.msk.f32.mxu0 %vm2590_vm0, %v2591_v1 }
  0x5d   :  { %2305 = vmatpush3.bf16.msra.mxu0 %v2738_v14 }
  0x5e   :  { %2312 = vmatprep.subr.bf16.mxu0 %v2589_v0 }
  0x5f   :  { %2073 = vmatmul.mubr.msk.f32.gmra.mrb[4].mxu0 %vm133_vm2, %v115_v63  ;;  %v119_v63 = vld [vmem:[#allocation2 + $0x30] sm:$0xff] }
  0x60   :  { %2075 = vmatprep.mubr.msk.f32.mxu0 %vm2590_vm0, %v2591_v1 }
  0xc1   :  { %v2760_v17 = vpop.permute.xlu0 %345 }
 0x128   :  { %v329_v18 = vpop.f32.mrb[0].mxu1 }
 0x129   :  { %v348_v19 = vadd.f32 %v2760_v17, %v329_v18  ;;  %v2097_v20 = vpop.f32.mrb[1].mxu1  ;;  %v225_v21 = vpop.f32.mrb[0].mxu0 }
 0x12a   :  { %v2068_v22 = vpop.f32.mrb[1].mxu0  ;;  %v226_v24 = vadd.f32 %v2767_v23, %v225_v21 }
 0x12b   :  { %350 = vrot.lane.b32.xlu0 %v348_v19, %s2592_s23  ;;  %v585_v19 = vsel %vm122_vm8, 1, %v2593_v29 }
 0x12c   :  { %v333_v25 = vadd.f32 %v329_v18, %v226_v24 }
 0x12e   :  { %v1927_v26 = vmul.f32 -1.442695, %v333_v25  ;;  %v230_v46 = vpop.f32.mrb[2].mxu0 }
 0x12f   :  { %v2071_v47 = vpop.f32.mrb[3].mxu0  ;;  %v231_v52 = vadd.f32 %v2767_v23, %v230_v46 }
 0x130   :  { %2381 = vpow2.f32 %v1927_v26 }
 0x132   :  { %v235_v11 = vpop.f32.mrb[4].mxu0 }
 0x133   :  { %v2074_v12 = vpop.f32.mrb[5].mxu0  ;;  %v236_v20 = vadd.f32 %v2767_v23, %v235_v11 }
 0x13a   :  { %v2382_v27 = vpop.eup %2381 }
 0x13b   :  { %v337_v28 = vadd.f32 1.0, %v2382_v27 }
 0x13d   :  { %2383 = vrcp.f32 %v337_v28 }
 0x147   :  { %v2384_v31 = vpop.eup %2383 }
 0x148   :  { %v360_v39 = vsub.f32 1.0, %v2384_v31  ;;  %v366_v42 = vmul.f32 0.0, %v2384_v31 }
 0x19d   :  { %v351_v32 = vpop.permute.xlu0 %350 }
 0x19e   :  { %v353_v33 = vmul.f32 %v2384_v31, %v351_v32 }
 0x1a0   :  { %355 = vrot.lane.b32.xlu1 %v353_v33, %s2592_s23  ;;  %v116_v33 = vld [vmem:[#allocation2 + $0x18] sm:$0xff] }
 0x1a1   :  { %2076 = vmatmul.mubr.msk.f32.gmra.mrb[6].mxu0 %vm133_vm2, %v116_v33 }
 0x1a2   :  { %2078 = vmatprep.mubr.msk.f32.mxu0 %vm2590_vm0, %v2591_v1 }
 0x1a4   :  { %370 = vperm.xlu1 %2379, %v368_v34  }
 0x212   :  { %v356_v35 = vpop.permute.xlu1 %355 }
 0x213   :  { %v358_v36 = vadd.f32 %v356_v35, %v226_v24 }
 0x215   :  { %2385 = vtanh.f32 %v358_v36 }
 0x21f   :  { %v2386_v38 = vpop.eup %2385 }
 0x220   :  { %362 = vrot.lane.b32.xlu0 %v2386_v38, %s2594_s0 }
 0x223   :  { %v2784_v40 = vpop.permute.xlu1 %370 }
 0x224   :  { %vm372_vm4 = vcmp.eq.s32.totalorder %v2784_v40, 1 }
 0x292   :  { %v363_v41 = vpop.permute.xlu0 %362 }
 0x293   :  { %v365_v43 = vmul.f32 %v363_v41, %v360_v39 }
 0x295   :  { %v367_v44 = vadd.f32 %v366_v42, %v365_v43  ;;  %v240_v43 = vpop.f32.mrb[6].mxu0 }
 0x297   :  { %v373_v45 = vsel %vm372_vm4, %v367_v44, 0.0  ;;  %v2077_v44 = vpop.f32.mrb[7].mxu0 }
 0x298   :  { %375 = vrot.lane.b32.xlu1 %v373_v45, %s2594_s0 }
 0x30a   :  { %v2790_v48 = vpop.permute.xlu1 %375 }
 0x30b   :  { %2107 = vmatmul.mubr.msk.f32.vlgmr.msra.gmra.mrb[2].mxu1 %vm259_vm5, %v2790_v48 }
 0x30c   :  { %2290 = vmatpush3.bf16.msra.mxu1 %v2731_v9  ;;  %2117 = vmatprep.mubr.msk.f32.mxu1 %vm2590_vm0, %v2591_v1 }
 0x30d   :  { %2291 = vmatprep.subr.bf16.mxu1 %v2589_v0 }
 0x310   :  { %2293 = vmatpush3.bf16.msra.mxu1 %v2738_v14 }
 0x311   :  { %2294 = vmatprep.subr.bf16.mxu1 %v2589_v0 }
 0x3de   :  { %v445_v49 = vpop.f32.mrb[2].mxu1 }
 0x3df   :  { %v456_v50 = vadd.f32 %v445_v49, %v2760_v17  ;;  %v2108_v51 = vpop.f32.mrb[3].mxu1  ;;  %v449_v53 = vadd.f32 %v445_v49, %v231_v52 }
 0x3e0   :  { %v241_v51 = vadd.f32 %v2767_v23, %v240_v43 }
 0x3e1   :  { %458 = vrot.lane.b32.xlu0 %v456_v50, %s2592_s23  ;;  %v1930_v54 = vmul.f32 -1.442695, %v449_v53  ;;  %v694_v50 = vsel %vm123_vm10, 1, %v2593_v29 }
 0x3e3   :  { %2387 = vpow2.f32 %v1930_v54 }
 0x3e5   :  { %478 = vperm.xlu0 %2380, %v476_v57  }
 0x3ed   :  { %v2388_v55 = vpop.eup %2387 }
 0x3ee   :  { %v453_v56 = vadd.f32 1.0, %v2388_v55 }
 0x3f0   :  { %2389 = vrcp.f32 %v453_v56 }
 0x3fa   :  { %v2390_v58 = vpop.eup %2389 }
 0x3fb   :  { %v468_v3 = vsub.f32 1.0, %v2390_v58  ;;  %v474_v6 = vmul.f32 %v2390_v58, %v373_v45 }
 0x453   :  { %v459_v59 = vpop.permute.xlu0 %458 }
 0x454   :  { %v461_v60 = vmul.f32 %v2390_v58, %v459_v59 }
 0x456   :  { %463 = vrot.lane.b32.xlu1 %v461_v60, %s2592_s23 }
 0x464   :  { %v2810_v4 = vpop.permute.xlu0 %478 }
 0x465   :  { %vm480_vm7 = vcmp.eq.s32.totalorder %v2810_v4, 1 }
 0x4c8   :  { %v464_v61 = vpop.permute.xlu1 %463 }
 0x4c9   :  { %v466_v62 = vadd.f32 %v464_v61, %v231_v52  ;;  %v117_v61 = vld [vmem:[#allocation2 + $0x20] sm:$0xff] }
 0x4ca   :  { %2079 = vmatmul.mubr.msk.f32.gmra.mrb[8].mxu0 %vm133_vm2, %v117_v61 }
 0x4cb   :  { %2391 = vtanh.f32 %v466_v62  ;;  %2081 = vmatprep.mubr.msk.f32.mxu0 %vm2590_vm0, %v2591_v1  ;;  %v118_v62 = vld [vmem:[#allocation2 + $0x28] sm:$0xff] }
 0x4ce   :  { %2082 = vmatmul.mubr.msk.f32.gmra.mrb[10].mxu0 %vm133_vm2, %v118_v62 }
 0x4cf   :  { %2084 = vmatprep.mubr.msk.f32.mxu0 %vm2590_vm0, %v2591_v1 }
 0x4d2   :  { %2085 = vmatmul.mubr.msk.f32.gmra.mrb[12].mxu0 %vm133_vm2, %v119_v63 }
 0x4d3   :  { %2139 = vmatprep.mubr.msk.f32.mxu0 %vm2590_vm0, %v2591_v1 }
 0x4d5   :  { %v2392_v2 = vpop.eup %2391 }
 0x4d6   :  { %470 = vrot.lane.b32.xlu1 %v2392_v2, %s2594_s0 }
 0x548   :  { %v471_v5 = vpop.permute.xlu1 %470 }
 0x549   :  { %v473_v7 = vmul.f32 %v471_v5, %v468_v3 }
 0x54b   :  { %v2813_v8 = vadd.f32 %v474_v6, %v473_v7 }
 0x54d   :  { %v481_v10 = vsel %vm480_vm7, %v2813_v8, %v373_v45 }
 0x54e   :  { %484 = vrot.lane.b32.xlu1 %v481_v10, %s2594_s0 }
 0x5c0   :  { %v485_v13 = vpop.permute.xlu1 %484 }
 0x5c1   :  { %2118 = vmatmul.mubr.msk.f32.vlgmr.msra.gmra.mrb[4].mxu1 %vm259_vm5, %v485_v13  ;;  %v245_v13 = vpop.f32.mrb[8].mxu0 }
 0x5c2   :  { %2296 = vmatpush3.bf16.msra.mxu1 %v2731_v9  ;;  %2128 = vmatprep.mubr.msk.f32.mxu1 %vm2590_vm0, %v2591_v1 }
 0x5c3   :  { %2297 = vmatprep.subr.bf16.mxu1 %v2589_v0 }
 0x5c6   :  { %2299 = vmatpush3.bf16.msra.mxu1 %v2738_v14 }
 0x5c7   :  { %2306 = vmatprep.subr.bf16.mxu1 %v2589_v0 }
 0x694   :  { %v554_v15 = vpop.f32.mrb[4].mxu1 }
 0x695   :  { %v565_v16 = vadd.f32 %v554_v15, %v2760_v17  ;;  %v2119_v18 = vpop.f32.mrb[5].mxu1  ;;  %v558_v21 = vadd.f32 %v554_v15, %v236_v20  ;;  %v2080_v15 = vpop.f32.mrb[9].mxu0 }
 0x697   :  { %567 = vrot.lane.b32.xlu0 %v565_v16, %s2592_s23  ;;  %v1932_v22 = vmul.f32 -1.442695, %v558_v21  ;;  %v2877_v16 = vpop.f32.mrb[10].mxu0 }
 0x698   :  { %v2083_v18 = vpop.f32.mrb[11].mxu0  ;;  %v251_v62 = vadd.f32 %v2767_v23, %v2877_v16  ;;  %v106_v16 = vld [vmem:[%s3162_s7] sm:$0xff] }
 0x699   :  { %2393 = vpow2.f32 %v1932_v22  ;;  %v107_v18 = vld [vmem:[%s3162_s7 + $0x8] sm:$0xff] }
 0x69b   :  { %587 = vperm.xlu0 %2380, %v585_v19   ;;  %v2879_v19 = vpop.f32.mrb[12].mxu0 }
 0x6a3   :  { %v2394_v24 = vpop.eup %2393 }
 0x6a4   :  { %v562_v25 = vadd.f32 1.0, %v2394_v24 }
 0x6a6   :  { %2395 = vrcp.f32 %v562_v25 }
 0x6b0   :  { %v2396_v26 = vpop.eup %2395 }
 0x6b1   :  { %v577_v35 = vsub.f32 1.0, %v2396_v26  ;;  %v583_v38 = vmul.f32 %v2396_v26, %v481_v10 }
 0x709   :  { %v568_v27 = vpop.permute.xlu0 %567 }
 0x70a   :  { %v570_v28 = vmul.f32 %v2396_v26, %v568_v27  ;;  %v803_v26 = vsel %vm124_vm12, 1, %v2593_v29 }
 0x70c   :  { %572 = vrot.lane.b32.xlu1 %v570_v28, %s2592_s23 }
 0x71a   :  { %v2836_v37 = vpop.permute.xlu0 %587 }
 0x71b   :  { %vm589_vm9 = vcmp.eq.s32.totalorder %v2836_v37, 1 }
 0x77e   :  { %v573_v31 = vpop.permute.xlu1 %572 }
 0x77f   :  { %v575_v32 = vadd.f32 %v573_v31, %v236_v20  ;;  %v2086_v20 = vpop.f32.mrb[13].mxu0 }
 0x780   :  { %v2927_v20 = vpack.c.bf16 %v107_v18, %v106_v16 }
 0x781   :  { %2397 = vtanh.f32 %v575_v32 }
 0x78b   :  { %v2398_v34 = vpop.eup %2397 }
 0x78c   :  { %579 = vrot.lane.b32.xlu1 %v2398_v34, %s2594_s0 }
 0x7fe   :  { %v580_v36 = vpop.permute.xlu1 %579 }
 0x7ff   :  { %v582_v39 = vmul.f32 %v580_v36, %v577_v35 }
 0x801   :  { %v2838_v41 = vadd.f32 %v583_v38, %v582_v39 }
 0x803   :  { %v590_v42 = vsel %vm589_vm9, %v2838_v41, %v481_v10 }
 0x804   :  { %593 = vrot.lane.b32.xlu0 %v590_v42, %s2594_s0 }
 0x876   :  { %v594_v45 = vpop.permute.xlu0 %593 }
 0x877   :  { %2129 = vmatmul.mubr.msk.f32.vlgmr.msra.gmra.mrb[6].mxu1 %vm259_vm5, %v594_v45 }
 0x878   :  { %2308 = vmatpush3.bf16.msra.mxu1 %v2731_v9  ;;  %2150 = vmatprep.mubr.msk.f32.mxu1 %vm2590_vm0, %v2591_v1 }
 0x879   :  { %2309 = vmatprep.subr.bf16.mxu1 %v2589_v0 }
 0x87c   :  { %2311 = vmatpush3.bf16.msra.mxu1 %v2738_v14 }
 0x87d   :  { %2318 = vmatprep.subr.bf16.mxu1 %v2589_v0 }
 0x94a   :  { %v663_v46 = vpop.f32.mrb[6].mxu1 }
 0x94b   :  { %v674_v47 = vadd.f32 %v663_v46, %v2760_v17  ;;  %v2130_v49 = vpop.f32.mrb[7].mxu1  ;;  %v667_v52 = vadd.f32 %v663_v46, %v241_v51 }
 0x94c   :  { %v102_v49 = vld [vmem:[#allocation8] sm:$0xff] }
 0x94d   :  { %676 = vrot.lane.b32.xlu1 %v674_v47, %s2592_s23  ;;  %v1934_v53 = vmul.f32 -1.442695, %v667_v52  ;;  %v104_v52 = vld [vmem:[#allocation8 + $0x10] sm:$0xff] }
 0x94f   :  { %2399 = vpow2.f32 %v1934_v53  ;;  %v105_v53 = vld [vmem:[#allocation8 + $0x18] sm:$0xff] }
 0x951   :  { %696 = vperm.xlu1 %2379, %v694_v50   ;;  %v103_v50 = vld [vmem:[#allocation8 + $0x8] sm:$0xff] }
 0x959   :  { %v2400_v54 = vpop.eup %2399 }
 0x95a   :  { %v671_v55 = vadd.f32 1.0, %v2400_v54 }
 0x95c   :  { %2401 = vrcp.f32 %v671_v55  ;;  %v2322_v55 = vpack.c.bf16 %v105_v53, %v104_v52 }
 0x966   :  { %v2402_v56 = vpop.eup %2401 }
 0x967   :  { %v686_v3 = vsub.f32 1.0, %v2402_v56  ;;  %v692_v7 = vmul.f32 %v2402_v56, %v590_v42 }
 0x9bf   :  { %v677_v57 = vpop.permute.xlu1 %676 }
 0x9c0   :  { %v679_v58 = vmul.f32 %v2402_v56, %v677_v57 }
 0x9c2   :  { %681 = vrot.lane.b32.xlu0 %v679_v58, %s2592_s23 }
 0x9d0   :  { %v2868_v6 = vpop.permute.xlu1 %696 }
 0x9d1   :  { %vm698_vm11 = vcmp.eq.s32.totalorder %v2868_v6, 1 }
 0xa34   :  { %v682_v59 = vpop.permute.xlu0 %681 }
 0xa35   :  { %v684_v60 = vadd.f32 %v682_v59, %v241_v51  ;;  %v2319_v51 = vpack.c.bf16 %v103_v50, %v102_v49  ;;  %v912_v59 = vsel %vm125_vm14, 1, %v2593_v29 }
 0xa37   :  { %2403 = vtanh.f32 %v684_v60 }
 0xa41   :  { %v2404_v2 = vpop.eup %2403 }
 0xa42   :  { %688 = vrot.lane.b32.xlu0 %v2404_v2, %s2594_s0 }
 0xab4   :  { %v689_v5 = vpop.permute.xlu0 %688 }
 0xab5   :  { %v691_v10 = vmul.f32 %v689_v5, %v686_v3 }
 0xab7   :  { %v2870_v11 = vadd.f32 %v692_v7, %v691_v10 }
 0xab9   :  { %v699_v12 = vsel %vm698_vm11, %v2870_v11, %v590_v42 }
 0xaba   :  { %702 = vrot.lane.b32.xlu1 %v699_v12, %s2594_s0 }
 0xb2c   :  { %v703_v21 = vpop.permute.xlu1 %702 }
 0xb2d   :  { %2140 = vmatmul.mubr.msk.f32.vlgmr.msra.gmra.mrb[14].mxu0 %vm259_vm5, %v703_v21  ;;  %v108_v21 = vld [vmem:[%s3162_s7 + $0x10] sm:$0xff] }
 0xb2e   :  { %2314 = vmatpush3.bf16.msra.mxu0 %v2731_v9  ;;  %2161 = vmatprep.mubr.msk.f32.mxu0 %vm2590_vm0, %v2591_v1  ;;  %v246_v9 = vadd.f32 %v2767_v23, %v245_v13 }
 0xb2f   :  { %2315 = vmatprep.subr.bf16.mxu0 %v2589_v0 }
 0xb32   :  { %2317 = vmatpush3.bf16.msra.mxu0 %v2738_v14 }
 0xb33   :  { %2324 = vmatprep.subr.bf16.mxu0 %v2589_v0 }
 0xc00   :  { %v772_v22 = vpop.f32.mrb[14].mxu0 }
 0xc01   :  { %v783_v24 = vadd.f32 %v772_v22, %v2760_v17  ;;  %v2141_v25 = vpop.f32.mrb[15].mxu0  ;;  %v776_v27 = vadd.f32 %v772_v22, %v246_v9  ;;  %v109_v22 = vld [vmem:[%s3162_s7 + $0x18] sm:$0xff] }
 0xc03   :  { %785 = vrot.lane.b32.xlu0 %v783_v24, %s2592_s23  ;;  %v1936_v28 = vmul.f32 -1.442695, %v776_v27  ;;  %v2937_v24 = vpack.c.bf16 %v109_v22, %v108_v21 }
 0xc05   :  { %2405 = vpow2.f32 %v1936_v28 }
 0xc07   :  { %805 = vperm.xlu0 %2380, %v803_v26  }
 0xc0f   :  { %v2406_v31 = vpop.eup %2405 }
 0xc10   :  { %v780_v14 = vadd.f32 1.0, %v2406_v31  ;;  %v1950_v31 = vld [vmem:[%s3164_s9] ss:$0 sm:$0xff] }
 0xc12   :  { %2407 = vrcp.f32 %v780_v14 }
 0xc1c   :  { %v2408_v32 = vpop.eup %2407 }
 0xc1d   :  { %v795_v39 = vsub.f32 1.0, %v2408_v32  ;;  %v801_v44 = vmul.f32 %v2408_v32, %v699_v12 }
 0xc75   :  { %v786_v33 = vpop.permute.xlu0 %785 }
 0xc76   :  { %v788_v34 = vmul.f32 %v2408_v32, %v786_v33 }
 0xc78   :  { %790 = vrot.lane.b32.xlu1 %v788_v34, %s2592_s23 }
 0xc86   :  { %v2895_v43 = vpop.permute.xlu0 %805 }
 0xc87   :  { %vm807_vm13 = vcmp.eq.s32.totalorder %v2895_v43, 1 }
 0xcea   :  { %v791_v35 = vpop.permute.xlu1 %790 }
 0xceb   :  { %v793_v36 = vadd.f32 %v791_v35, %v246_v9 }
 0xced   :  { %2409 = vtanh.f32 %v793_v36 }
 0xcf7   :  { %v2410_v38 = vpop.eup %2409 }
 0xcf8   :  { %797 = vrot.lane.b32.xlu1 %v2410_v38, %s2594_s0 }
 0xd6a   :  { %v798_v42 = vpop.permute.xlu1 %797 }
 0xd6b   :  { %v800_v45 = vmul.f32 %v798_v42, %v795_v39 }
 0xd6d   :  { %v2897_v46 = vadd.f32 %v801_v44, %v800_v45  ;;  %v2980_v44 = vld [vmem:[%s3163_s8] ss:$0 sm:$0xff]  ;;  %s2595_s8 = smov [#allocation10]  }
 0xd6e   :  { %s1904_s18 = sshll.u32 %s2595_s8, 4  ;;  %s1905_s18 = int_to_ptr.vmem [resolvable:$true] %s1904_s18 }
 0xd6f   :  { %v808_v47 = vsel %vm807_vm13, %v2897_v46, %v699_v12  ;;  %s2553_s2 = scalar_lea.vmem %s1905_s18, 256  ;;  %p2558_p5 = scmp.lt.s32.totalorder %s1905_s18, %s1905_s18 }
 0xd70   :  { %811 = vrot.lane.b32.xlu0 %v808_v47, %s2594_s0  ;;  %p2554_p4 = scmp.ne.s32.totalorder %s1905_s18, %s2553_s2  ;;  %p2559_p6 = scmp.lt.s32.totalorder %s2553_s2, %s2553_s2 }
 0xd72   :  { %p2560_p7 = por %p2559_p6, %p2558_p5 }
 0xd74   :  { %p2561_p8 = pnand %p2560_p7, %p2554_p4 }
 0xde2   :  { %v812_v54 = vpop.permute.xlu0 %811 }
 0xde3   :  { %2151 = vmatmul.mubr.msk.f32.vlgmr.msra.gmra.mrb[8].mxu1 %vm259_vm5, %v812_v54 }
 0xde4   :  { %2320 = vmatpush3.bf16.msra.mxu1 %v2319_v51  ;;  %2172 = vmatprep.mubr.msk.f32.mxu1 %vm2590_vm0, %v2591_v1 }
 0xde5   :  { %2321 = vmatprep.subr.bf16.mxu1 %v2589_v0 }
 0xde8   :  { %2323 = vmatpush3.bf16.msra.mxu1 %v2322_v55 }
 0xde9   :  { %2342 = vmatprep.subr.bf16.mxu1 %v2589_v0 }
 0xdeb   :  { %2173 = vmatmul.mubr.msk.f32.vlgmr.msra.gmra.mrb[10].mxu1 %vm259_vm5, %v2790_v48 }
 0xdec   :  { %2175 = vmatprep.mubr.msk.f32.mxu1 %vm2590_vm0, %v2591_v1  ;;  %2344 = vmatpush3.bf16.msra.mxu1 %v2927_v20 }
 0xded   :  { %2345 = vmatprep.subr.bf16.mxu1 %v2589_v0 }
 0xdf0   :  { %2347 = vmatpush3.bf16.msra.mxu1 %v2937_v24 }
 0xdf1   :  { %2354 = vmatprep.subr.bf16.mxu1 %v2589_v0 }
 0xeb6   :  { %v881_v56 = vpop.f32.mrb[8].mxu1 }
 0xeb7   :  { %v892_v57 = vadd.f32 %v881_v56, %v2760_v17  ;;  %v2152_v58 = vpop.f32.mrb[9].mxu1  ;;  %v885_v48 = vadd.f32 %v881_v56, %v251_v62 }
 0xeb8   :  { %v482_v58 = vsel %vm480_vm7, %v2813_v8, 0.0 }
 0xeb9   :  { %894 = vrot.lane.b32.xlu1 %v892_v57, %s2592_s23  ;;  %v1938_v63 = vmul.f32 -1.442695, %v885_v48 }
 0xebb   :  { %2411 = vpow2.f32 %v1938_v63 }
 0xebd   :  { %914 = vperm.xlu1 %2379, %v912_v59  }
 0xebe   :  { %v1130_v60 = vpop.f32.mrb[10].mxu1 }
 0xebf   :  { %v2174_v61 = vpop.f32.mrb[11].mxu1  ;;  %v1131_v45 = vadd.f32 %v2980_v44, %v1130_v60 }
 0xec5   :  { %v2412_v2 = vpop.eup %2411 }
 0xec6   :  { %v889_v3 = vadd.f32 1.0, %v2412_v2 }
 0xec8   :  { %2413 = vrcp.f32 %v889_v3 }
 0xed2   :  { %v2414_v5 = vpop.eup %2413 }
 0xed3   :  { %v904_v25 = vsub.f32 1.0, %v2414_v5  ;;  %v910_v27 = vmul.f32 %v2414_v5, %v808_v47 }
 0xf2b   :  { %v895_v7 = vpop.permute.xlu1 %894 }
 0xf2c   :  { %v897_v10 = vmul.f32 %v2414_v5, %v895_v7 }
 0xf2e   :  { %899 = vrot.lane.b32.xlu0 %v897_v10, %s2592_s23 }
 0xf3c   :  { %v2941_v9 = vpop.permute.xlu1 %914 }
 0xf3d   :  { %vm916_vm15 = vcmp.eq.s32.totalorder %v2941_v9, 1 }
 0xfa0   :  { %v900_v12 = vpop.permute.xlu0 %899 }
 0xfa1   :  { %v902_v13 = vadd.f32 %v900_v12, %v251_v62 }
 0xfa3   :  { %2415 = vtanh.f32 %v902_v13 }
 0xfad   :  { %v2416_v15 = vpop.eup %2415 }
 0xfae   :  { %906 = vrot.lane.b32.xlu0 %v2416_v15, %s2594_s0 }
 0xfb2   :  { %1246 = vrot.lane.b32.xlu0 %v1950_v31, %s2592_s23  ;;  %v591_v31 = vsel %vm589_vm9, %v2838_v41, 0.0 }
0x1020   :  { %v907_v26 = vpop.permute.xlu0 %906 }
0x1021   :  { %v909_v28 = vmul.f32 %v907_v26, %v904_v25 }
0x1023   :  { %v2947_v14 = vadd.f32 %v910_v27, %v909_v28 }
0x1024   :  { %v2973_v36 = vpop.permute.xlu0 %1246 }
0x1025   :  { %v2953_v32 = vsel %vm916_vm15, %v2947_v14, %v808_v47 }
0x1026   :  { %920 = vrot.lane.b32.xlu1 %v2953_v32, %s2594_s0 }
0x1098   :  { %v921_v33 = vpop.permute.xlu1 %920 }
0x1099   :  { %2162 = vmatmul.mubr.msk.f32.vlgmr.msra.gmra.mrb[16].mxu0 %vm259_vm5, %v921_v33 }
0x109a   :  { %2326 = vmatpush3.bf16.msra.mxu0 %v2927_v20  ;;  %2201 = vmatprep.mubr.msk.f32.mxu0 %vm2590_vm0, %v2591_v1 }
0x109b   :  { %2327 = vmatprep.subr.bf16.mxu0 %v2589_v0 }
0x109e   :  { %2329 = vmatpush3.bf16.msra.mxu0 %v2937_v24 }
0x109f   :  { %2330 = vmatprep.subr.bf16.mxu0 %v2589_v0 }
0x10a1   :  { %2202 = vmatmul.mubr.f32.vlgmr.msra.gmra.mrb[18].mxu0 %v2591_v1 }
0x10a2   :  { %2332 = vmatpush3.bf16.msra.mxu0 %v2927_v20  ;;  %2212 = vmatprep.mubr.msk.f32.mxu0 %vm2590_vm0, %v2591_v1 }
0x10a3   :  { %2333 = vmatprep.subr.bf16.mxu0 %v2589_v0 }
0x10a6   :  { %2335 = vmatpush3.bf16.msra.mxu0 %v2937_v24 }
0x10a7   :  { %2336 = vmatprep.subr.bf16.mxu0 %v2589_v0 }
0x116c   :  { %v2971_v34 = vpop.f32.mrb[16].mxu0 }
0x116d   :  { %v2163_v35 = vpop.f32.mrb[17].mxu0  ;;  %v1001_v41 = vadd.f32 %v2971_v34, %v2760_v17 }
0x1174   :  { %v1230_v38 = vpop.f32.mrb[18].mxu0 }
0x1175   :  { %v1249_v39 = vadd.f32 %v2973_v36, %v1230_v38  ;;  %v2203_v42 = vpop.f32.mrb[19].mxu0  ;;  %v1234_v47 = vadd.f32 %v1230_v38, %v1131_v45 }
0x1177   :  { %1251 = vrot.lane.b32.xlu1 %v1249_v39, %s2592_s23  ;;  %v1949_v49 = vmul.f32 -1.442695, %v1234_v47 }
0x1179   :  { %2417 = vpow2.f32 %v1949_v49  ;;  %v256_v49 = vadd.f32 %v2767_v23, %v2879_v19  ;;  %v1021_v19 = vsel %vm126_vm1, 1, %v2593_v29 }
0x1183   :  { %v2418_v50 = vpop.eup %2417 }
0x1184   :  { %v1238_v51 = vadd.f32 1.0, %v2418_v50  ;;  %v994_v50 = vadd.f32 %v2971_v34, %v256_v49 }
0x1186   :  { %2419 = vrcp.f32 %v1238_v51  ;;  %v1940_v51 = vmul.f32 -1.442695, %v994_v50 }
0x1190   :  { %v2420_v52 = vpop.eup %2419 }
0x1191   :  { %v1261_v59 = vsub.f32 1.0, %v2420_v52  ;;  %v1267_v61 = vmul.f32 0.0, %v2420_v52 }
0x11e9   :  { %v1252_v53 = vpop.permute.xlu1 %1251 }
0x11ea   :  { %v1254_v54 = vmul.f32 %v2420_v52, %v1252_v53 }
0x11ec   :  { %1256 = vrot.lane.b32.xlu0 %v1254_v54, %s2592_s23 }
0x125e   :  { %v1257_v55 = vpop.permute.xlu0 %1256 }
0x125f   :  { %v1259_v56 = vadd.f32 %v1257_v55, %v1131_v45 }
0x1261   :  { %2421 = vtanh.f32 %v1259_v56 }
0x126b   :  { %v2422_v57 = vpop.eup %2421 }
0x126c   :  { %1263 = vrot.lane.b32.xlu1 %v2422_v57, %s2594_s0 }
0x1270   :  { %1040 = vrot.lane.b32.xlu1 %v482_v58, %s2594_s0 }
0x12de   :  { %v1264_v60 = vpop.permute.xlu1 %1263 }
0x12df   :  { %v1266_v62 = vmul.f32 %v1264_v60, %v1261_v59 }
0x12e1   :  { %v1268_v48 = vadd.f32 %v1267_v61, %v1266_v62 }
0x12e2   :  { %v1041_v63 = vpop.permute.xlu1 %1040 }
0x12e3   :  { %2176 = vmatmul.mubr.msk.f32.gmra.mrb[12].mxu1 %vm259_vm5, %v1041_v63  ;;  %v1269_v2 = vsel %vm372_vm4, %v1268_v48, 0.0 }
0x12e4   :  { %1271 = vrot.lane.b32.xlu0 %v1269_v2, %s2594_s0  ;;  %2178 = vmatprep.mubr.msk.f32.mxu1 %vm2590_vm0, %v2591_v1 }
0x1356   :  { %v1272_v3 = vpop.permute.xlu0 %1271 }
0x1357   :  { %2213 = vmatmul.mubr.msk.f32.vlgmr.msra.gmra.mrb[20].mxu0 %vm259_vm5, %v1272_v3 }
0x1358   :  { %2338 = vmatpush3.bf16.msra.mxu0 %v2927_v20  ;;  %2223 = vmatprep.mubr.msk.f32.mxu0 %vm2590_vm0, %v2591_v1 }
0x1359   :  { %2339 = vmatprep.subr.bf16.mxu0 %v2589_v0 }
0x135c   :  { %2341 = vmatpush3.bf16.msra.mxu0 %v2937_v24 }
0x135d   :  { %2348 = vmatprep.subr.bf16.mxu0 %v2589_v0 }
0x13b6   :  { %v1135_v40 = vpop.f32.mrb[12].mxu1 }
0x13b7   :  { %v2177_v8 = vpop.f32.mrb[13].mxu1  ;;  %v1136_v12 = vadd.f32 %v2980_v44, %v1135_v40 }
0x13b8   :  { %v700_v8 = vsel %vm698_vm11, %v2870_v11, 0.0 }
0x142a   :  { %v1341_v5 = vpop.f32.mrb[20].mxu0 }
0x142b   :  { %v1352_v7 = vadd.f32 %v1341_v5, %v2973_v36  ;;  %v2214_v10 = vpop.f32.mrb[21].mxu0  ;;  %v1345_v13 = vadd.f32 %v1341_v5, %v1136_v12  ;;  %v918_v5 = vsel %vm916_vm15, %v2947_v14, 0.0 }
0x142d   :  { %1354 = vrot.lane.b32.xlu0 %v1352_v7, %s2592_s23  ;;  %v1952_v15 = vmul.f32 -1.442695, %v1345_v13 }
0x142f   :  { %2423 = vpow2.f32 %v1952_v15 }
0x1439   :  { %v2424_v16 = vpop.eup %2423 }
0x143a   :  { %v1349_v18 = vadd.f32 1.0, %v2424_v16 }
0x143c   :  { %2425 = vrcp.f32 %v1349_v18 }
0x1446   :  { %v2426_v21 = vpop.eup %2425 }
0x1447   :  { %v1364_v33 = vsub.f32 1.0, %v2426_v21  ;;  %v1370_v38 = vmul.f32 %v2426_v21, %v1269_v2 }
0x149f   :  { %v1355_v22 = vpop.permute.xlu0 %1354 }
0x14a0   :  { %v1357_v25 = vmul.f32 %v2426_v21, %v1355_v22  ;;  %v809_v22 = vsel %vm807_vm13, %v2897_v46, 0.0 }
0x14a2   :  { %1359 = vrot.lane.b32.xlu1 %v1357_v25, %s2592_s23 }
0x1514   :  { %v1360_v26 = vpop.permute.xlu1 %1359 }
0x1515   :  { %v1362_v27 = vadd.f32 %v1360_v26, %v1136_v12 }
0x1517   :  { %2427 = vtanh.f32 %v1362_v27 }
0x1518   :  { %2429 = vpow2.f32 %v1940_v51 }
0x1521   :  { %v2428_v28 = vpop.eup %2427 }
0x1522   :  { %1366 = vrot.lane.b32.xlu0 %v2428_v28, %s2594_s0  ;;  %v2430_v4 = vpop.eup %2429 }
0x1523   :  { %v998_v52 = vadd.f32 1.0, %v2430_v4 }
0x1525   :  { %2431 = vrcp.f32 %v998_v52 }
0x1526   :  { %1042 = vrot.lane.b32.xlu0 %v591_v31, %s2594_s0 }
0x152f   :  { %v2432_v17 = vpop.eup %2431 }
0x1530   :  { %v1013_v15 = vsub.f32 1.0, %v2432_v17  ;;  %v1019_v18 = vmul.f32 %v2432_v17, %v2953_v32 }
0x1594   :  { %v1367_v35 = vpop.permute.xlu0 %1366 }
0x1595   :  { %v1369_v39 = vmul.f32 %v1367_v35, %v1364_v33 }
0x1597   :  { %v1371_v42 = vadd.f32 %v1370_v38, %v1369_v39 }
0x1598   :  { %v1043_v45 = vpop.permute.xlu0 %1042 }
0x1599   :  { %2179 = vmatmul.mubr.msk.f32.gmra.mrb[14].mxu1 %vm259_vm5, %v1043_v45  ;;  %v3014_v47 = vsel %vm480_vm7, %v1371_v42, %v1269_v2 }
0x159a   :  { %1374 = vrot.lane.b32.xlu1 %v3014_v47, %s2594_s0  ;;  %2181 = vmatprep.mubr.msk.f32.mxu1 %vm2590_vm0, %v2591_v1 }
0x159e   :  { %1003 = vrot.lane.b32.xlu1 %v1001_v41, %s2592_s23 }
0x160c   :  { %v1375_v53 = vpop.permute.xlu1 %1374 }
0x160d   :  { %2224 = vmatmul.mubr.msk.f32.vlgmr.msra.gmra.mrb[22].mxu0 %vm259_vm5, %v1375_v53 }
0x160e   :  { %2350 = vmatpush3.bf16.msra.mxu0 %v2927_v20  ;;  %2245 = vmatprep.mubr.msk.f32.mxu0 %vm2590_vm0, %v2591_v1 }
0x160f   :  { %2351 = vmatprep.subr.bf16.mxu0 %v2589_v0 }
0x1610   :  { %v1004_v54 = vpop.permute.xlu1 %1003 }
0x1611   :  { %v1006_v23 = vmul.f32 %v2432_v17, %v1004_v54 }
0x1612   :  { %2353 = vmatpush3.bf16.msra.mxu0 %v2937_v24 }
0x1613   :  { %1008 = vrot.lane.b32.xlu1 %v1006_v23, %s2592_s23  ;;  %2360 = vmatprep.subr.bf16.mxu0 %v2589_v0 }
0x1617   :  { %1023 = vperm.xlu1 %2379, %v1021_v19  }
0x166c   :  { %v1140_v34 = vpop.f32.mrb[14].mxu1 }
0x166d   :  { %v2180_v55 = vpop.f32.mrb[15].mxu1  ;;  %v1141_v59 = vadd.f32 %v2980_v44, %v1140_v34 }
0x1685   :  { %v1009_v48 = vpop.permute.xlu1 %1008 }
0x1686   :  { %v1011_v63 = vadd.f32 %v1009_v48, %v256_v49 }
0x1696   :  { %v3054_v14 = vpop.permute.xlu1 %1023 }
0x1697   :  { %vm1025_vm2 = vcmp.eq.s32.totalorder %v3054_v14, 1 }
0x16e0   :  { %v1444_v56 = vpop.f32.mrb[22].mxu0 }
0x16e1   :  { %v1455_v57 = vadd.f32 %v1444_v56, %v2973_v36  ;;  %v2225_v58 = vpop.f32.mrb[23].mxu0  ;;  %v1448_v30 = vadd.f32 %v1444_v56, %v1141_v59 }
0x16e3   :  { %1457 = vrot.lane.b32.xlu0 %v1455_v57, %s2592_s23  ;;  %v1954_v60 = vmul.f32 -1.442695, %v1448_v30 }
0x16e5   :  { %2433 = vpow2.f32 %v1954_v60 }
0x16ef   :  { %v2434_v61 = vpop.eup %2433 }
0x16f0   :  { %v1452_v62 = vadd.f32 1.0, %v2434_v61 }
0x16f2   :  { %2435 = vrcp.f32 %v1452_v62 }
0x16f3   :  { %2437 = vtanh.f32 %v1011_v63 }
0x16fc   :  { %v2436_v29 = vpop.eup %2435 }
0x16fd   :  { %v2438_v40 = vpop.eup %2437  ;;  %v1467_v26 = vsub.f32 1.0, %v2436_v29  ;;  %v1473_v28 = vmul.f32 %v2436_v29, %v3014_v47 }
0x1755   :  { %v1458_v2 = vpop.permute.xlu0 %1457 }
0x1756   :  { %v1460_v3 = vmul.f32 %v2436_v29, %v1458_v2 }
0x1758   :  { %1462 = vrot.lane.b32.xlu0 %v1460_v3, %s2592_s23 }
0x175c   :  { %1015 = vrot.lane.b32.xlu0 %v2438_v40, %s2594_s0 }
0x1760   :  { %1044 = vrot.lane.b32.xlu0 %v700_v8, %s2594_s0 }
0x1764   :  { %1048 = vrot.lane.b32.xlu0 %v918_v5, %s2594_s0 }
0x17ca   :  { %v1463_v7 = vpop.permute.xlu0 %1462 }
0x17cb   :  { %v1465_v10 = vadd.f32 %v1463_v7, %v1141_v59 }
0x17cd   :  { %2439 = vtanh.f32 %v1465_v10 }
0x17ce   :  { %v1016_v12 = vpop.permute.xlu0 %1015 }
0x17cf   :  { %v1018_v16 = vmul.f32 %v1016_v12, %v1013_v15 }
0x17d1   :  { %v3056_v21 = vadd.f32 %v1019_v18, %v1018_v16 }
0x17d2   :  { %v1045_v13 = vpop.permute.xlu0 %1044 }
0x17d3   :  { %2182 = vmatmul.mubr.msk.f32.gmra.mrb[16].mxu1 %vm259_vm5, %v1045_v13  ;;  %v1027_v25 = vsel %vm1025_vm2, %v3056_v21, 0.0 }
0x17d4   :  { %2184 = vmatprep.mubr.msk.f32.mxu1 %vm2590_vm0, %v2591_v1 }
0x17d6   :  { %v1049_v38 = vpop.permute.xlu0 %1048 }
0x17d7   :  { %v2440_v11 = vpop.eup %2439 }
0x17d8   :  { %1469 = vrot.lane.b32.xlu1 %v2440_v11, %s2594_s0 }
0x17dc   :  { %1046 = vrot.lane.b32.xlu1 %v809_v22, %s2594_s0 }
0x17e0   :  { %1050 = vrot.lane.b32.xlu1 %v1027_v25, %s2594_s0 }
0x184a   :  { %v1470_v27 = vpop.permute.xlu1 %1469 }
0x184b   :  { %v1472_v31 = vmul.f32 %v1470_v27, %v1467_v26 }
0x184d   :  { %v1474_v33 = vadd.f32 %v1473_v28, %v1472_v31 }
0x184e   :  { %v1047_v35 = vpop.permute.xlu1 %1046 }
0x184f   :  { %2185 = vmatmul.mubr.msk.f32.gmra.mrb[18].mxu1 %vm259_vm5, %v1047_v35  ;;  %v1475_v46 = vsel %vm589_vm9, %v1474_v33, %v3014_v47 }
0x1850   :  { %1477 = vrot.lane.b32.xlu0 %v1475_v46, %s2594_s0  ;;  %2187 = vmatprep.mubr.msk.f32.mxu1 %vm2590_vm0, %v2591_v1 }
0x1852   :  { %v1051_v39 = vpop.permute.xlu1 %1050 }
0x1853   :  { %2188 = vmatmul.mubr.msk.f32.gmra.mrb[20].mxu1 %vm259_vm5, %v1049_v38 }
0x1854   :  { %2190 = vmatprep.mubr.msk.f32.mxu1 %vm2590_vm0, %v2591_v1 }
0x1857   :  { %2191 = vmatmul.mubr.msk.f32.gmra.mrb[22].mxu1 %vm259_vm5, %v1051_v39 }
0x1858   :  { %2234 = vmatprep.mubr.msk.f32.mxu1 %vm2590_vm0, %v2591_v1 }
0x18a6   :  { %v1145_v42 = vpop.f32.mrb[16].mxu1 }
0x18a7   :  { %v2183_v37 = vpop.f32.mrb[17].mxu1  ;;  %v1146_v54 = vadd.f32 %v2980_v44, %v1145_v42 }
0x18c2   :  { %v1478_v45 = vpop.permute.xlu0 %1477 }
0x18c3   :  { %2235 = vmatmul.mubr.msk.f32.vlgmr.msra.gmra.mrb[24].mxu1 %vm259_vm5, %v1478_v45 }
0x18c4   :  { %2356 = vmatpush3.bf16.msra.mxu1 %v2927_v20  ;;  %2256 = vmatprep.mubr.msk.f32.mxu1 %vm2590_vm0, %v2591_v1 }
0x18c5   :  { %2357 = vmatprep.subr.bf16.mxu1 %v2589_v0 }
0x18c8   :  { %2359 = vmatpush3.bf16.msra.mxu1 %v2937_v24 }
0x1922   :  { %v1150_v47 = vpop.f32.mrb[18].mxu1 }
0x1923   :  { %v2186_v41 = vpop.f32.mrb[19].mxu1  ;;  %v1151_v6 = vadd.f32 %v2980_v44, %v1150_v47 }
0x1926   :  { %v3087_v49 = vpop.f32.mrb[20].mxu1 }
0x1927   :  { %v2189_v50 = vpop.f32.mrb[21].mxu1 }
0x192a   :  { %v3089_v51 = vpop.f32.mrb[22].mxu1 }
0x192b   :  { %v2192_v4 = vpop.f32.mrb[23].mxu1 }
0x1996   :  { %v1547_v52 = vpop.f32.mrb[24].mxu1 }
0x1997   :  { %v1558_v53 = vadd.f32 %v1547_v52, %v2973_v36  ;;  %v2236_v17 = vpop.f32.mrb[25].mxu1  ;;  %v1551_v23 = vadd.f32 %v1547_v52, %v1146_v54 }
0x1999   :  { %1560 = vrot.lane.b32.xlu1 %v1558_v53, %s2592_s23  ;;  %v1956_v19 = vmul.f32 -1.442695, %v1551_v23 }
0x199b   :  { %2441 = vpow2.f32 %v1956_v19 }
0x19a5   :  { %v2442_v34 = vpop.eup %2441 }
0x19a6   :  { %v1555_v55 = vadd.f32 1.0, %v2442_v34 }
0x19a8   :  { %2443 = vrcp.f32 %v1555_v55 }
0x19b2   :  { %v2444_v56 = vpop.eup %2443 }
0x19b3   :  { %v1570_v61 = vsub.f32 1.0, %v2444_v56  ;;  %v1576_v48 = vmul.f32 %v2444_v56, %v1475_v46 }
0x1a0b   :  { %v1561_v57 = vpop.permute.xlu1 %1560 }
0x1a0c   :  { %v1563_v58 = vmul.f32 %v2444_v56, %v1561_v57  ;;  %v1161_v57 = vadd.f32 %v2980_v44, %v3089_v51 }
0x1a0e   :  { %1565 = vrot.lane.b32.xlu0 %v1563_v58, %s2592_s23 }
0x1a80   :  { %v1566_v59 = vpop.permute.xlu0 %1565 }
0x1a81   :  { %v1568_v30 = vadd.f32 %v1566_v59, %v1146_v54 }
0x1a83   :  { %2445 = vtanh.f32 %v1568_v30 }
0x1a8d   :  { %v2446_v60 = vpop.eup %2445 }
0x1a8e   :  { %1572 = vrot.lane.b32.xlu1 %v2446_v60, %s2594_s0 }
0x1b00   :  { %v1573_v62 = vpop.permute.xlu1 %1572 }
0x1b01   :  { %v1575_v63 = vmul.f32 %v1573_v62, %v1570_v61 }
0x1b03   :  { %v1577_v29 = vadd.f32 %v1576_v48, %v1575_v63 }
0x1b05   :  { %v1578_v2 = vsel %vm698_vm11, %v1577_v29, %v1475_v46  ;;  %v1156_v46 = vadd.f32 %v2980_v44, %v3087_v49 }
0x1b06   :  { %1580 = vrot.lane.b32.xlu0 %v1578_v2, %s2594_s0 }
0x1b78   :  { %v1581_v3 = vpop.permute.xlu0 %1580 }
0x1b79   :  { %2246 = vmatmul.mubr.msk.f32.vlgmr.msra.gmra.mrb[24].mxu0 %vm259_vm5, %v1581_v3 }
0x1b7a   :  { %2362 = vmatpush3.bf16.msra.mxu0 %v2927_v20  ;;  %2267 = vmatprep.mubr.msk.f32.mxu0 %vm2590_vm0, %v2591_v1 }
0x1b7b   :  { %2363 = vmatprep.subr.bf16.mxu0 %v2589_v0 }
0x1b7e   :  { %2365 = vmatpush3.bf16.msra.mxu0 %v2937_v24 }
0x1c4c   :  { %v1650_v40 = vpop.f32.mrb[24].mxu0 }
0x1c4d   :  { %v1661_v8 = vadd.f32 %v1650_v40, %v2973_v36  ;;  %v2247_v5 = vpop.f32.mrb[25].mxu0  ;;  %v1654_v7 = vadd.f32 %v1650_v40, %v1151_v6 }
0x1c4f   :  { %1663 = vrot.lane.b32.xlu1 %v1661_v8, %s2592_s23  ;;  %v1958_v10 = vmul.f32 -1.442695, %v1654_v7 }
0x1c51   :  { %2447 = vpow2.f32 %v1958_v10 }
0x1c5b   :  { %v2448_v12 = vpop.eup %2447 }
0x1c5c   :  { %v1658_v20 = vadd.f32 1.0, %v2448_v12 }
0x1c5e   :  { %2449 = vrcp.f32 %v1658_v20 }
0x1c68   :  { %v2450_v13 = vpop.eup %2449 }
0x1c69   :  { %v1673_v16 = vsub.f32 1.0, %v2450_v13  ;;  %v1679_v22 = vmul.f32 %v2450_v13, %v1578_v2 }
0x1cc1   :  { %v1664_v1 = vpop.permute.xlu1 %1663 }
0x1cc2   :  { %v1666_v15 = vmul.f32 %v2450_v13, %v1664_v1 }
0x1cc4   :  { %1668 = vrot.lane.b32.xlu0 %v1666_v15, %s2592_s23 }
0x1d36   :  { %v1669_v0 = vpop.permute.xlu0 %1668 }
0x1d37   :  { %v1671_v24 = vadd.f32 %v1669_v0, %v1151_v6 }
0x1d39   :  { %2451 = vtanh.f32 %v1671_v24 }
0x1d43   :  { %v2452_v11 = vpop.eup %2451 }
0x1d44   :  { %1675 = vrot.lane.b32.xlu1 %v2452_v11, %s2594_s0 }
0x1db6   :  { %v1676_v18 = vpop.permute.xlu1 %1675 }
0x1db7   :  { %v1678_v25 = vmul.f32 %v1676_v18, %v1673_v16 }
0x1db9   :  { %v1680_v26 = vadd.f32 %v1679_v22, %v1678_v25 }
0x1dbb   :  { %v1681_v27 = vsel %vm807_vm13, %v1680_v26, %v1578_v2 }
0x1dbc   :  { %1683 = vrot.lane.b32.xlu0 %v1681_v27, %s2594_s0 }
0x1e2e   :  { %v1684_v28 = vpop.permute.xlu0 %1683 }
0x1e2f   :  { %2257 = vmatmul.mubr.msk.f32.vlgmr.msra.gmra.mrb[26].mxu1 %vm259_vm5, %v1684_v28 }
0x1f02   :  { %v1753_v31 = vpop.f32.mrb[26].mxu1 }
0x1f03   :  { %v1764_v33 = vadd.f32 %v1753_v31, %v2973_v36  ;;  %v2258_v35 = vpop.f32.mrb[27].mxu1  ;;  %v1757_v38 = vadd.f32 %v1753_v31, %v1156_v46 }
0x1f05   :  { %1766 = vrot.lane.b32.xlu1 %v1764_v33, %s2592_s23  ;;  %v1960_v39 = vmul.f32 -1.442695, %v1757_v38 }
0x1f07   :  { %2453 = vpow2.f32 %v1960_v39 }
0x1f11   :  { %v2454_v42 = vpop.eup %2453 }
0x1f12   :  { %v1761_v43 = vadd.f32 1.0, %v2454_v42 }
0x1f14   :  { %2455 = vrcp.f32 %v1761_v43 }
0x1f1e   :  { %v2456_v37 = vpop.eup %2455 }
0x1f1f   :  { %v1776_v52 = vsub.f32 1.0, %v2456_v37  ;;  %v1782_v49 = vmul.f32 %v2456_v37, %v1681_v27 }
0x1f77   :  { %v1767_v45 = vpop.permute.xlu1 %1766 }
0x1f78   :  { %v1769_v47 = vmul.f32 %v2456_v37, %v1767_v45 }
0x1f7a   :  { %1771 = vrot.lane.b32.xlu0 %v1769_v47, %s2592_s23 }
0x1fec   :  { %v1772_v41 = vpop.permute.xlu0 %1771 }
0x1fed   :  { %v1774_v50 = vadd.f32 %v1772_v41, %v1156_v46 }
0x1fef   :  { %2457 = vtanh.f32 %v1774_v50 }
0x1ff9   :  { %v2458_v4 = vpop.eup %2457 }
0x1ffa   :  { %1778 = vrot.lane.b32.xlu1 %v2458_v4, %s2594_s0 }
0x206c   :  { %v1779_v53 = vpop.permute.xlu1 %1778 }
0x206d   :  { %v1781_v17 = vmul.f32 %v1779_v53, %v1776_v52 }
0x206f   :  { %v1783_v54 = vadd.f32 %v1782_v49, %v1781_v17 }
0x2071   :  { %v1784_v23 = vsel %vm916_vm15, %v1783_v54, %v1681_v27 }
0x2072   :  { %1786 = vrot.lane.b32.xlu0 %v1784_v23, %s2594_s0 }
0x20e4   :  { %v1787_v19 = vpop.permute.xlu0 %1786 }
0x20e5   :  { %2268 = vmatmul.mubr.msk.f32.vlgmr.msra.gmra.mrb[26].mxu0 %vm259_vm5, %v1787_v19 }
0x21b8   :  { %v1856_v34 = vpop.f32.mrb[26].mxu0 }
0x21b9   :  { %v1867_v55 = vadd.f32 %v1856_v34, %v2973_v36  ;;  %v2269_v56 = vpop.f32.mrb[27].mxu0  ;;  %v1860_v58 = vadd.f32 %v1856_v34, %v1161_v57  ;;  %v1026_v36 = vsel %vm1025_vm2, %v3056_v21, %v2953_v32 }
0x21bb   :  { %1869 = vrot.lane.b32.xlu1 %v1867_v55, %s2592_s23  ;;  %v1962_v59 = vmul.f32 -1.442695, %v1860_v58 }
0x21bd   :  { %2459 = vpow2.f32 %v1962_v59 }
0x21c7   :  { %v2460_v30 = vpop.eup %2459 }
0x21c8   :  { %v1864_v9 = vadd.f32 1.0, %v2460_v30 }
0x21ca   :  { %2461 = vrcp.f32 %v1864_v9 }
0x21d4   :  { %v2462_v60 = vpop.eup %2461 }
0x21d5   :  { %v1879_v29 = vsub.f32 1.0, %v2462_v60  ;;  %v1885_v3 = vmul.f32 %v2462_v60, %v1784_v23 }
0x222d   :  { %v1870_v61 = vpop.permute.xlu1 %1869 }
0x222e   :  { %v1872_v62 = vmul.f32 %v2462_v60, %v1870_v61 }
0x2230   :  { %1874 = vrot.lane.b32.xlu0 %v1872_v62, %s2592_s23 }
0x2234   :  { %1889 = vrot.lane.b32.xlu0 %v1026_v36, %s2594_s0 }
0x22a2   :  { %v1875_v48 = vpop.permute.xlu0 %1874 }
0x22a3   :  { %v1877_v44 = vadd.f32 %v1875_v48, %v1161_v57 }
0x22a5   :  { %2463 = vtanh.f32 %v1877_v44 }
0x22a6   :  { %v1890_v51 = vpop.permute.xlu0 %1889 }
0x22a7   :  { %1892 = vst.msk [vmem:[#allocation10] sm:$0xff] %vm259_vm5, %v1890_v51 }
0x22af   :  { %v2464_v63 = vpop.eup %2463 }
0x22b0   :  { %1881 = vrot.lane.b32.xlu1 %v2464_v63, %s2594_s0 }
0x2322   :  { %v1882_v2 = vpop.permute.xlu1 %1881 }
0x2323   :  { %v1884_v40 = vmul.f32 %v1882_v2, %v1879_v29 }
0x2325   :  { %v1886_v8 = vadd.f32 %v1885_v3, %v1884_v40 }
0x2327   :  { %v1887_v5 = vsel %vm1025_vm2, %v1886_v8, %v1784_v23 }
0x2328   :  { %1894 = vrot.lane.b32.xlu1 %v1887_v5, %s2594_s0 }
0x239a   :  { %v1895_v32 = vpop.permute.xlu1 %1894 }
0x239b   :  { %1898 = vst.msk [vmem:[#allocation10 + $0x8] sm:$0xff] %vm259_vm5, %v1895_v32 }
0x239c   :  { %2564 = shalt.err (!%p2561_p8)
}
0x239d   :  { %s2565_s21 = scalar_lea.hbm %s3165_s10, 256 }
0x239e   :  { %p2566_p9 = scmp.ne.s32.totalorder %s3165_s10, %s2565_s21  ;;  %p2569_p10 = scmp.lt.u32.totalorder %s2565_s21, %s3165_s10 }
0x23a0   :  { %p2571_p11 = pnand %p2569_p10, %p2566_p9 }
0x23a2   :  { %2574 = shalt.err (!%p2571_p11)
}
0x23a3   :  { %1910 = dma.vmem_to_hbm [thread:$0]  %s1905_s18, 256, %s3165_s10, [#allocation4], %s2585_s25, %s2585_s25, %s2586_s26  }
0x23a4   :  { %2581 = dma.done.wait [#allocation4], 256  }
0x23a5   :  { %2582 = vsyncadd [#allocation4], 4294967040 }
0x23a6   :  { %1914 = vsyncpa [#allocation3], 1 }
0x23a7   :  { %1915 = vsyncpa [#allocation6], 1 }
0x23a8   :  { %1916 = vsyncpa [#allocation9], 1 }
0x23a9   :  { %1917 = vsyncpa [#allocation4], 1 }

</bundles_post_ra>
